<compile_context>
chip_gen: v7x
topology: tpu7x:2x2x1
jax: 0.10.0
libtpu: 0.0.40
codegen_flags: <defaults>
</compile_context>

<pallas_src>
from functools import partial

import jax
import jax.numpy as jnp
from jax import lax
from jax.experimental import pallas as pl
from jax.experimental.pallas import tpu as pltpu

# ---------------- synthetic vision-encoder config (small) -------------------
IMAGE_SIZE = 16
PATCH_SIZE = 8
NUM_CHANNELS = 4
HIDDEN = 32
NUM_HEADS = 2
HEAD_DIM = HIDDEN // NUM_HEADS
INTERMEDIATE = 64
NUM_LAYERS = 2
LN_EPS = 1e-6
BATCH = 2

NUM_PATCHES = (IMAGE_SIZE // PATCH_SIZE) ** 2          # 4
SEQ = NUM_PATCHES + 1                                  # +1 CLS token -> 5
PATCH_DIM = NUM_CHANNELS * PATCH_SIZE * PATCH_SIZE     # 256
TOKENS = BATCH * SEQ                                   # batch fused into rows


# ----------------------- packed-parameter row layout -------------------------
def _ru8(n):
    return (n + 7) // 8 * 8


# pack32: every segment is (rows, HIDDEN=32) f32, segment starts 8-row aligned.
ROWS_W_PATCH = PATCH_DIM
ROWS_EMBED_BIAS = _ru8(TOKENS)
ROWS_MASK = _ru8(TOKENS)
VEC_ROWS = _ru8(6 + 3 * NUM_HEADS)        # ln1_g, ln1_b, ln2_g, ln2_b, b_o, b2, b_q/b_k/b_v per head
HEAD_ROWS = 4 * HEAD_DIM                  # w_qT, w_kT, w_vT, w_o-head (each HEAD_DIM rows)
LAYER_ROWS = VEC_ROWS + NUM_HEADS * HEAD_ROWS + INTERMEDIATE   # + w2 rows
FINAL_VEC_ROWS = _ru8(3)                  # ln_f_g, ln_f_b, b_pool

OFF_W_PATCH = 0
OFF_EMBED_BIAS = OFF_W_PATCH + ROWS_W_PATCH
OFF_MASK = OFF_EMBED_BIAS + ROWS_EMBED_BIAS
OFF_LAYER0 = OFF_MASK + ROWS_MASK
OFF_FINAL = OFF_LAYER0 + NUM_LAYERS * LAYER_ROWS
PACK32_ROWS = OFF_FINAL + FINAL_VEC_ROWS + HIDDEN

# pack64: (rows, INTERMEDIATE=64) f32; per layer: w1 (HIDDEN rows) + b1 (1 row).
LAYER_ROWS64 = _ru8(HIDDEN + 1)
PACK64_ROWS = NUM_LAYERS * LAYER_ROWS64

CONTRACT_LAST = (((1,), (1,)), ((), ()))  # A @ B.T without an explicit transpose


# --------------------------- in-kernel helpers -------------------------------
def _layernorm(x, g, b):
    mu = jnp.mean(x, axis=-1, keepdims=True)
    c = x - mu
    var = jnp.mean(c * c, axis=-1, keepdims=True)
    return c * lax.rsqrt(var + LN_EPS) * g + b


def _erf(x):
    # Abramowitz & Stegun 7.1.26 (|err| <= 1.5e-7); the divide goes through the
    # EUP approximate reciprocal (review item: frees VALU work).
    t = pl.reciprocal(1.0 + 0.3275911 * jnp.abs(x), approx=True)
    poly = t * (0.254829592 + t * (-0.284496736 + t * (1.421413741
               + t * (-1.453152027 + t * 1.061405429))))
    y = 1.0 - poly * jnp.exp(-x * x)
    return jnp.where(x >= 0.0, y, -y)


def _gelu_exact(x):
    # HF ViT's default hidden_act="gelu" is the exact (erf) GELU.
    return 0.5 * x * (1.0 + _erf(x * 0.7071067811865476))


# ------------------------------ fused kernel ---------------------------------
def fused_vit_kernel(patches_ref, p32_ref, p64_ref, hidden_ref, pooled_ref):
    scale = HEAD_DIM ** -0.5

    # ---- patch embedding; CLS token / positional / patch-bias folded into one
    #      precomputed additive row block (zero "CLS" patch row -> bias row). ----
    w_patch = p32_ref[OFF_W_PATCH:OFF_W_PATCH + PATCH_DIM, :]
    x = jnp.dot(patches_ref[...], w_patch, preferred_element_type=jnp.float32)
    x = x + p32_ref[OFF_EMBED_BIAS:OFF_EMBED_BIAS + TOKENS, :]          # (T, H)

    # additive block-diagonal mask keeps the fused batch rows independent
    neg = p32_ref[OFF_MASK:OFF_MASK + TOKENS, 0:TOKENS]                 # (T, T)

    for l in range(NUM_LAYERS):                    # tiny static unroll (L=2)
        lb = OFF_LAYER0 + l * LAYER_ROWS

        # ---- pre-LN multi-head self-attention over all B*S rows at once ----
        h = _layernorm(x, p32_ref[lb + 0:lb + 1, :], p32_ref[lb + 1:lb + 2, :])
        attn = p32_ref[lb + 4:lb + 5, :]           # accumulator starts at b_o
        for n in range(NUM_HEADS):                 # static unroll (2 heads)
            mh = lb + VEC_ROWS + n * HEAD_ROWS
            bq = p32_ref[lb + 6 + n:lb + 7 + n, 0:HEAD_DIM]
            bk = p32_ref[lb + 6 + NUM_HEADS + n:lb + 7 + NUM_HEADS + n, 0:HEAD_DIM]
            bv = p32_ref[lb + 6 + 2 * NUM_HEADS + n:lb + 7 + 2 * NUM_HEADS + n, 0:HEAD_DIM]
            # per-head projections from transposed (HEAD_DIM, HIDDEN) weights:
            # lane-aligned dots, no lane-offset slicing of a fused QKV output.
            qh = lax.dot_general(h, p32_ref[mh:mh + HEAD_DIM, :],
                                 CONTRACT_LAST,
                                 preferred_element_type=jnp.float32) + bq
            kh = lax.dot_general(h, p32_ref[mh + HEAD_DIM:mh + 2 * HEAD_DIM, :],
                                 CONTRACT_LAST,
                                 preferred_element_type=jnp.float32) + bk
            vh = lax.dot_general(h, p32_ref[mh + 2 * HEAD_DIM:mh + 3 * HEAD_DIM, :],
                                 CONTRACT_LAST,
                                 preferred_element_type=jnp.float32) + bv
            # scores over the fused rows + block-diagonal mask, online-stable softmax
            s = lax.dot_general(qh, kh, CONTRACT_LAST,
                                preferred_element_type=jnp.float32) * scale + neg
            s = s - jnp.max(s, axis=-1, keepdims=True)
            p = jnp.exp(s)
            p = p * pl.reciprocal(jnp.sum(p, axis=-1, keepdims=True), approx=True)
            ctx = jnp.dot(p, vh, preferred_element_type=jnp.float32)
            # fold this head straight through its rows of W_o (no concat)
            attn = attn + jnp.dot(ctx, p32_ref[mh + 3 * HEAD_DIM:mh + 4 * HEAD_DIM, :],
                                  preferred_element_type=jnp.float32)
        x = x + attn                               # residual (b_o already in attn)

        # ---- pre-LN GELU MLP ----
        h2 = _layernorm(x, p32_ref[lb + 2:lb + 3, :], p32_ref[lb + 3:lb + 4, :])
        fb = l * LAYER_ROWS64
        ff = jnp.dot(h2, p64_ref[fb:fb + HIDDEN, :],
                     preferred_element_type=jnp.float32) \
            + p64_ref[fb + HIDDEN:fb + HIDDEN + 1, :]
        ff = _gelu_exact(ff)
        w2_off = lb + VEC_ROWS + NUM_HEADS * HEAD_ROWS
        x = x + jnp.dot(ff, p32_ref[w2_off:w2_off + INTERMEDIATE, :],
                        preferred_element_type=jnp.float32) \
              + p32_ref[lb + 5:lb + 6, :]

    # ---- final LayerNorm, dense last_hidden slab store, tanh pooler on CLS ----
    x = _layernorm(x, p32_ref[OFF_FINAL:OFF_FINAL + 1, :],
                   p32_ref[OFF_FINAL + 1:OFF_FINAL + 2, :])
    hidden_ref[...] = x                                             # (T, H) slab

    cls_rows = jnp.concatenate(
        [x[b * SEQ:b * SEQ + 1, :] for b in range(BATCH)], axis=0)  # (B, H)
    w_pool = p32_ref[OFF_FINAL + FINAL_VEC_ROWS:
                     OFF_FINAL + FINAL_VEC_ROWS + HIDDEN, :]
    pooled_ref[...] = jnp.tanh(
        jnp.dot(cls_rows, w_pool, preferred_element_type=jnp.float32)
        + p32_ref[OFF_FINAL + 2:OFF_FINAL + 3, :])


# ------------------------------- wrapper --------------------------------------
def vision_encoder(packed, pixel_values):
    """Forward pass of VisionEncoderExportableModule: model(pixel_values=...)."""
    B = pixel_values.shape[0]
    assert B == BATCH, "packed embed-bias / mask are laid out for BATCH images"

    # patch extraction (pure data movement): NCHW -> [B, N_patches, C*P*P],
    # then a zero "CLS" row per image and batch fused into the row axis.
    gp = IMAGE_SIZE // PATCH_SIZE
    x = pixel_values.reshape(B, NUM_CHANNELS, gp, PATCH_SIZE, gp, PATCH_SIZE)
    patches = x.transpose(0, 2, 4, 1, 3, 5).reshape(B, NUM_PATCHES, PATCH_DIM)
    patches = jnp.pad(patches, ((0, 0), (1, 0), (0, 0)))       # (B, SEQ, PD)
    patches_flat = patches.reshape(TOKENS, PATCH_DIM)          # (B*SEQ, PD)

    vmem = pl.BlockSpec(memory_space=pltpu.MemorySpace.VMEM)
    hidden_flat, pooled = pl.pallas_call(
        fused_vit_kernel,
        out_shape=(jax.ShapeDtypeStruct((TOKENS, HIDDEN), jnp.float32),
                   jax.ShapeDtypeStruct((BATCH, HIDDEN), jnp.float32)),
        in_specs=[vmem, vmem, vmem],        # 3 input DMAs total (was 21)
        out_specs=(vmem, vmem),
    )(patches_flat, packed["p32"], packed["p64"])

    last_hidden = hidden_flat.reshape(BATCH, SEQ, HIDDEN)
    return last_hidden, pooled              # last_hidden_state, pooler_output


# --------------------------- deterministic init ------------------------------
def init_params(key):
    ks = jax.random.split(key, 4 + NUM_LAYERS)

    def w(k, shape):
        return (0.02 * jax.random.normal(k, shape)).astype(jnp.float32)

    zeros = lambda s: jnp.zeros(s, jnp.float32)
    ones = lambda s: jnp.ones(s, jnp.float32)

    layers = []
    for i in range(NUM_LAYERS):
        lk = jax.random.split(ks[4 + i], 6)
        layers.append(dict(
            ln1_g=ones((HIDDEN,)), ln1_b=zeros((HIDDEN,)),
            w_q=w(lk[0], (HIDDEN, HIDDEN)), b_q=zeros((HIDDEN,)),
            w_k=w(lk[1], (HIDDEN, HIDDEN)), b_k=zeros((HIDDEN,)),
            w_v=w(lk[2], (HIDDEN, HIDDEN)), b_v=zeros((HIDDEN,)),
            w_o=w(lk[3], (HIDDEN, HIDDEN)), b_o=zeros((HIDDEN,)),
            ln2_g=ones((HIDDEN,)), ln2_b=zeros((HIDDEN,)),
            w1=w(lk[4], (HIDDEN, INTERMEDIATE)), b1=zeros((INTERMEDIATE,)),
            w2=w(lk[5], (INTERMEDIATE, HIDDEN)), b2=zeros((HIDDEN,)),
        ))
    return dict(
        w_patch=w(ks[0], (PATCH_DIM, HIDDEN)), b_patch=zeros((HIDDEN,)),
        cls=w(ks[1], (HIDDEN,)), pos=w(ks[2], (SEQ, HIDDEN)),
        layers=layers,
        ln_f_g=ones((HIDDEN,)), ln_f_b=zeros((HIDDEN,)),
        w_pool=w(ks[3], (HIDDEN, HIDDEN)), b_pool=zeros((HIDDEN,)),
    )


def pack_params(p):
    """One-time packing of all weights into two flat VMEM-friendly slabs."""
    def rows(a, width):
        a = jnp.asarray(a, jnp.float32)
        if a.ndim == 1:
            a = a.reshape(1, -1)
        if a.shape[1] < width:
            a = jnp.pad(a, ((0, 0), (0, width - a.shape[1])))
        return a

    def put(buf, off, a, width):
        a = rows(a, width)
        return buf.at[off:off + a.shape[0], :].set(a)

    p32 = jnp.zeros((PACK32_ROWS, HIDDEN), jnp.float32)
    p32 = put(p32, OFF_W_PATCH, p["w_patch"], HIDDEN)

    # fused CLS / positional / patch-bias additive rows, tiled over batch
    per_img = jnp.concatenate(
        [(p["cls"] + p["pos"][0])[None, :],
         p["b_patch"][None, :] + p["pos"][1:]], axis=0)              # (SEQ, H)
    p32 = put(p32, OFF_EMBED_BIAS, jnp.tile(per_img, (BATCH, 1)), HIDDEN)

    # additive block-diagonal attention mask over fused batch*seq rows
    bid = jnp.repeat(jnp.arange(BATCH), SEQ)
    mask = jnp.where(bid[:, None] == bid[None, :], 0.0, -1e30).astype(jnp.float32)
    p32 = put(p32, OFF_MASK, mask, HIDDEN)

    for l, lp in enumerate(p["layers"]):
        lb = OFF_LAYER0 + l * LAYER_ROWS
        p32 = put(p32, lb + 0, lp["ln1_g"], HIDDEN)
        p32 = put(p32, lb + 1, lp["ln1_b"], HIDDEN)
        p32 = put(p32, lb + 2, lp["ln2_g"], HIDDEN)
        p32 = put(p32, lb + 3, lp["ln2_b"], HIDDEN)
        p32 = put(p32, lb + 4, lp["b_o"], HIDDEN)
        p32 = put(p32, lb + 5, lp["b2"], HIDDEN)
        for n in range(NUM_HEADS):
            lo = n * HEAD_DIM
            p32 = put(p32, lb + 6 + n, lp["b_q"][lo:lo + HEAD_DIM], HIDDEN)
            p32 = put(p32, lb + 6 + NUM_HEADS + n, lp["b_k"][lo:lo + HEAD_DIM], HIDDEN)
            p32 = put(p32, lb + 6 + 2 * NUM_HEADS + n, lp["b_v"][lo:lo + HEAD_DIM], HIDDEN)
            mh = lb + VEC_ROWS + n * HEAD_ROWS
            p32 = put(p32, mh + 0 * HEAD_DIM, lp["w_q"][:, lo:lo + HEAD_DIM].T, HIDDEN)
            p32 = put(p32, mh + 1 * HEAD_DIM, lp["w_k"][:, lo:lo + HEAD_DIM].T, HIDDEN)
            p32 = put(p32, mh + 2 * HEAD_DIM, lp["w_v"][:, lo:lo + HEAD_DIM].T, HIDDEN)
            p32 = put(p32, mh + 3 * HEAD_DIM, lp["w_o"][lo:lo + HEAD_DIM, :], HIDDEN)
        p32 = put(p32, lb + VEC_ROWS + NUM_HEADS * HEAD_ROWS, lp["w2"], HIDDEN)

    p32 = put(p32, OFF_FINAL + 0, p["ln_f_g"], HIDDEN)
    p32 = put(p32, OFF_FINAL + 1, p["ln_f_b"], HIDDEN)
    p32 = put(p32, OFF_FINAL + 2, p["b_pool"], HIDDEN)
    p32 = put(p32, OFF_FINAL + FINAL_VEC_ROWS, p["w_pool"], HIDDEN)

    p64 = jnp.zeros((PACK64_ROWS, INTERMEDIATE), jnp.float32)
    for l, lp in enumerate(p["layers"]):
        base = l * LAYER_ROWS64
        p64 = put(p64, base, lp["w1"], INTERMEDIATE)
        p64 = put(p64, base + HIDDEN, lp["b1"], INTERMEDIATE)

    return dict(p32=p32, p64=p64)


# TODO(synk): the wrapped HF model's exact architecture/config and the
# save_config_to_constant_methods / method_meta metadata side-channel (and the
# debug prints / torch.export machinery) have no Pallas equivalent; a
# representative ViT encoder is instantiated synthetically.

if __name__ == "__main__":
    key = jax.random.PRNGKey(0)
    pkey, xkey = jax.random.split(key)
    packed = pack_params(init_params(pkey))

    pixel_values = jax.random.normal(
        xkey, (BATCH, NUM_CHANNELS, IMAGE_SIZE, IMAGE_SIZE), jnp.float32)

    fwd = jax.jit(partial(vision_encoder, packed))
    last_hidden, pooled = fwd(pixel_values)
    jax.block_until_ready((last_hidden, pooled))

    assert last_hidden.shape == (BATCH, SEQ, HIDDEN)
    assert pooled.shape == (BATCH, HIDDEN)
    assert bool(jnp.all(jnp.isfinite(last_hidden)))
    assert bool(jnp.all(jnp.isfinite(pooled)))
    print("KERNEL_OK")
</pallas_src>

<mosaic_0001>
module attributes {stable_mosaic.version = 11 : i64} {
  func.func @fused_vit_kernel(%arg0: memref<10x256xf32, #tpu.memory_space<vmem>>, %arg1: memref<744x32xf32, #tpu.memory_space<vmem>>, %arg2: memref<80x64xf32, #tpu.memory_space<vmem>>, %arg3: memref<10x32xf32, #tpu.memory_space<vmem>>, %arg4: memref<2x32xf32, #tpu.memory_space<vmem>>) attributes {dimension_semantics = [], scalar_prefetch = 0 : i64, scratch_operands = 0 : i64, tpu.core_type = #tpu.core_type<tc>} {
    %c0 = arith.constant 0 : index
    %c0_0 = arith.constant 0 : index
    %0 = vector.load %arg1[%c0, %c0_0] : memref<744x32xf32, #tpu.memory_space<vmem>>, vector<256x32xf32>
    %c0_1 = arith.constant 0 : index
    %c0_2 = arith.constant 0 : index
    %1 = vector.load %arg0[%c0_1, %c0_2] : memref<10x256xf32, #tpu.memory_space<vmem>>, vector<10x256xf32>
    %cst = arith.constant dense<0.000000e+00> : vector<10x32xf32>
    %2 = tpu.matmul %1, %0, %cst {dimension_numbers = #tpu.dot_dimension_numbers<[1], [0], [0], [1], [0, 0, 1, 1], [], []>} : vector<10x256xf32>, vector<256x32xf32>, vector<10x32xf32> -> vector<10x32xf32>
    %c256 = arith.constant 256 : index
    %c0_3 = arith.constant 0 : index
    %3 = vector.load %arg1[%c256, %c0_3] : memref<744x32xf32, #tpu.memory_space<vmem>>, vector<10x32xf32>
    %4 = arith.addf %2, %3 : vector<10x32xf32>
    %c272 = arith.constant 272 : index
    %c0_4 = arith.constant 0 : index
    %5 = vector.load %arg1[%c272, %c0_4] : memref<744x32xf32, #tpu.memory_space<vmem>>, vector<10x10xf32>
    %c288 = arith.constant 288 : index
    %c0_5 = arith.constant 0 : index
    %6 = vector.load %arg1[%c288, %c0_5] : memref<744x32xf32, #tpu.memory_space<vmem>>, vector<1x32xf32>
    %c289 = arith.constant 289 : index
    %c0_6 = arith.constant 0 : index
    %7 = vector.load %arg1[%c289, %c0_6] : memref<744x32xf32, #tpu.memory_space<vmem>>, vector<1x32xf32>
    %cst_7 = arith.constant dense<0.000000e+00> : vector<10xf32>
    %8 = vector.multi_reduction <add>, %4, %cst_7 [1] : vector<10x32xf32> to vector<10xf32>
    %9 = vector.shape_cast %8 : vector<10xf32> to vector<10x1xf32>
    %cst_8 = arith.constant 3.200000e+01 : f32
    %10 = vector.broadcast %cst_8 : f32 to vector<10x1xf32>
    %11 = arith.divf %9, %10 : vector<10x1xf32>
    %12 = vector.broadcast %11 : vector<10x1xf32> to vector<10x32xf32>
    %13 = arith.subf %4, %12 : vector<10x32xf32>
    %14 = arith.mulf %13, %13 : vector<10x32xf32>
    %cst_9 = arith.constant dense<0.000000e+00> : vector<10xf32>
    %15 = vector.multi_reduction <add>, %14, %cst_9 [1] : vector<10x32xf32> to vector<10xf32>
    %16 = vector.shape_cast %15 : vector<10xf32> to vector<10x1xf32>
    %cst_10 = arith.constant 3.200000e+01 : f32
    %17 = vector.broadcast %cst_10 : f32 to vector<10x1xf32>
    %18 = arith.divf %16, %17 : vector<10x1xf32>
    %cst_11 = arith.constant 9.99999997E-7 : f32
    %19 = vector.broadcast %cst_11 : f32 to vector<10x1xf32>
    %20 = arith.addf %18, %19 : vector<10x1xf32>
    %21 = math.rsqrt %20 : vector<10x1xf32>
    %22 = vector.broadcast %21 : vector<10x1xf32> to vector<10x32xf32>
    %23 = arith.mulf %13, %22 : vector<10x32xf32>
    %24 = vector.broadcast %6 : vector<1x32xf32> to vector<10x32xf32>
    %25 = arith.mulf %23, %24 : vector<10x32xf32>
    %26 = vector.broadcast %7 : vector<1x32xf32> to vector<10x32xf32>
    %27 = arith.addf %25, %26 : vector<10x32xf32>
    %c292 = arith.constant 292 : index
    %c0_12 = arith.constant 0 : index
    %28 = vector.load %arg1[%c292, %c0_12] : memref<744x32xf32, #tpu.memory_space<vmem>>, vector<1x32xf32>
    %c294 = arith.constant 294 : index
    %c0_13 = arith.constant 0 : index
    %29 = vector.load %arg1[%c294, %c0_13] : memref<744x32xf32, #tpu.memory_space<vmem>>, vector<1x16xf32>
    %c296 = arith.constant 296 : index
    %c0_14 = arith.constant 0 : index
    %30 = vector.load %arg1[%c296, %c0_14] : memref<744x32xf32, #tpu.memory_space<vmem>>, vector<1x16xf32>
    %c298 = arith.constant 298 : index
    %c0_15 = arith.constant 0 : index
    %31 = vector.load %arg1[%c298, %c0_15] : memref<744x32xf32, #tpu.memory_space<vmem>>, vector<1x16xf32>
    %c304 = arith.constant 304 : index
    %c0_16 = arith.constant 0 : index
    %32 = vector.load %arg1[%c304, %c0_16] : memref<744x32xf32, #tpu.memory_space<vmem>>, vector<16x32xf32>
    %cst_17 = arith.constant dense<0.000000e+00> : vector<10x16xf32>
    %33 = tpu.matmul %27, %32, %cst_17 {dimension_numbers = #tpu.dot_dimension_numbers<[1], [1], [0], [0], [0, 0, 1, 0], [], []>} : vector<10x32xf32>, vector<16x32xf32>, vector<10x16xf32> -> vector<10x16xf32>
    %34 = vector.broadcast %29 : vector<1x16xf32> to vector<10x16xf32>
    %35 = arith.addf %33, %34 : vector<10x16xf32>
    %c320 = arith.constant 320 : index
    %c0_18 = arith.constant 0 : index
    %36 = vector.load %arg1[%c320, %c0_18] : memref<744x32xf32, #tpu.memory_space<vmem>>, vector<16x32xf32>
    %cst_19 = arith.constant dense<0.000000e+00> : vector<10x16xf32>
    %37 = tpu.matmul %27, %36, %cst_19 {dimension_numbers = #tpu.dot_dimension_numbers<[1], [1], [0], [0], [0, 0, 1, 0], [], []>} : vector<10x32xf32>, vector<16x32xf32>, vector<10x16xf32> -> vector<10x16xf32>
    %38 = vector.broadcast %30 : vector<1x16xf32> to vector<10x16xf32>
    %39 = arith.addf %37, %38 : vector<10x16xf32>
    %c336 = arith.constant 336 : index
    %c0_20 = arith.constant 0 : index
    %40 = vector.load %arg1[%c336, %c0_20] : memref<744x32xf32, #tpu.memory_space<vmem>>, vector<16x32xf32>
    %cst_21 = arith.constant dense<0.000000e+00> : vector<10x16xf32>
    %41 = tpu.matmul %27, %40, %cst_21 {dimension_numbers = #tpu.dot_dimension_numbers<[1], [1], [0], [0], [0, 0, 1, 0], [], []>} : vector<10x32xf32>, vector<16x32xf32>, vector<10x16xf32> -> vector<10x16xf32>
    %42 = vector.broadcast %31 : vector<1x16xf32> to vector<10x16xf32>
    %43 = arith.addf %41, %42 : vector<10x16xf32>
    %cst_22 = arith.constant dense<0.000000e+00> : vector<10x10xf32>
    %44 = tpu.matmul %35, %39, %cst_22 {dimension_numbers = #tpu.dot_dimension_numbers<[1], [1], [0], [0], [0, 0, 1, 0], [], []>} : vector<10x16xf32>, vector<10x16xf32>, vector<10x10xf32> -> vector<10x10xf32>
    %cst_23 = arith.constant 2.500000e-01 : f32
    %45 = vector.broadcast %cst_23 : f32 to vector<10x10xf32>
    %46 = arith.mulf %44, %45 : vector<10x10xf32>
    %47 = arith.addf %46, %5 : vector<10x10xf32>
    %cst_24 = arith.constant dense<0xFF800000> : vector<10xf32>
    %48 = vector.multi_reduction <maximumf>, %47, %cst_24 [1] : vector<10x10xf32> to vector<10xf32>
    %49 = vector.shape_cast %48 : vector<10xf32> to vector<10x1xf32>
    %50 = vector.broadcast %49 : vector<10x1xf32> to vector<10x10xf32>
    %51 = arith.subf %47, %50 : vector<10x10xf32>
    %52 = math.exp %51 : vector<10x10xf32>
    %cst_25 = arith.constant dense<0.000000e+00> : vector<10xf32>
    %53 = vector.multi_reduction <add>, %52, %cst_25 [1] : vector<10x10xf32> to vector<10xf32>
    %54 = vector.shape_cast %53 : vector<10xf32> to vector<10x1xf32>
    %55 = tpu.reciprocal %54 {approx = true} : vector<10x1xf32> -> vector<10x1xf32>
    %56 = vector.broadcast %55 : vector<10x1xf32> to vector<10x10xf32>
    %57 = arith.mulf %52, %56 : vector<10x10xf32>
    %cst_26 = arith.constant dense<0.000000e+00> : vector<10x16xf32>
    %58 = tpu.matmul %57, %43, %cst_26 {dimension_numbers = #tpu.dot_dimension_numbers<[1], [0], [0], [1], [0, 0, 1, 1], [], []>} : vector<10x10xf32>, vector<10x16xf32>, vector<10x16xf32> -> vector<10x16xf32>
    %c352 = arith.constant 352 : index
    %c0_27 = arith.constant 0 : index
    %59 = vector.load %arg1[%c352, %c0_27] : memref<744x32xf32, #tpu.memory_space<vmem>>, vector<16x32xf32>
    %cst_28 = arith.constant dense<0.000000e+00> : vector<10x32xf32>
    %60 = tpu.matmul %58, %59, %cst_28 {dimension_numbers = #tpu.dot_dimension_numbers<[1], [0], [0], [1], [0, 0, 1, 1], [], []>} : vector<10x16xf32>, vector<16x32xf32>, vector<10x32xf32> -> vector<10x32xf32>
    %61 = vector.broadcast %28 : vector<1x32xf32> to vector<10x32xf32>
    %62 = arith.addf %61, %60 : vector<10x32xf32>
    %c295 = arith.constant 295 : index
    %c0_29 = arith.constant 0 : index
    %63 = vector.load %arg1[%c295, %c0_29] : memref<744x32xf32, #tpu.memory_space<vmem>>, vector<1x16xf32>
    %c297 = arith.constant 297 : index
    %c0_30 = arith.constant 0 : index
    %64 = vector.load %arg1[%c297, %c0_30] : memref<744x32xf32, #tpu.memory_space<vmem>>, vector<1x16xf32>
    %c299 = arith.constant 299 : index
    %c0_31 = arith.constant 0 : index
    %65 = vector.load %arg1[%c299, %c0_31] : memref<744x32xf32, #tpu.memory_space<vmem>>, vector<1x16xf32>
    %c368 = arith.constant 368 : index
    %c0_32 = arith.constant 0 : index
    %66 = vector.load %arg1[%c368, %c0_32] : memref<744x32xf32, #tpu.memory_space<vmem>>, vector<16x32xf32>
    %cst_33 = arith.constant dense<0.000000e+00> : vector<10x16xf32>
    %67 = tpu.matmul %27, %66, %cst_33 {dimension_numbers = #tpu.dot_dimension_numbers<[1], [1], [0], [0], [0, 0, 1, 0], [], []>} : vector<10x32xf32>, vector<16x32xf32>, vector<10x16xf32> -> vector<10x16xf32>
    %68 = vector.broadcast %63 : vector<1x16xf32> to vector<10x16xf32>
    %69 = arith.addf %67, %68 : vector<10x16xf32>
    %c384 = arith.constant 384 : index
    %c0_34 = arith.constant 0 : index
    %70 = vector.load %arg1[%c384, %c0_34] : memref<744x32xf32, #tpu.memory_space<vmem>>, vector<16x32xf32>
    %cst_35 = arith.constant dense<0.000000e+00> : vector<10x16xf32>
    %71 = tpu.matmul %27, %70, %cst_35 {dimension_numbers = #tpu.dot_dimension_numbers<[1], [1], [0], [0], [0, 0, 1, 0], [], []>} : vector<10x32xf32>, vector<16x32xf32>, vector<10x16xf32> -> vector<10x16xf32>
    %72 = vector.broadcast %64 : vector<1x16xf32> to vector<10x16xf32>
    %73 = arith.addf %71, %72 : vector<10x16xf32>
    %c400 = arith.constant 400 : index
    %c0_36 = arith.constant 0 : index
    %74 = vector.load %arg1[%c400, %c0_36] : memref<744x32xf32, #tpu.memory_space<vmem>>, vector<16x32xf32>
    %cst_37 = arith.constant dense<0.000000e+00> : vector<10x16xf32>
    %75 = tpu.matmul %27, %74, %cst_37 {dimension_numbers = #tpu.dot_dimension_numbers<[1], [1], [0], [0], [0, 0, 1, 0], [], []>} : vector<10x32xf32>, vector<16x32xf32>, vector<10x16xf32> -> vector<10x16xf32>
    %76 = vector.broadcast %65 : vector<1x16xf32> to vector<10x16xf32>
    %77 = arith.addf %75, %76 : vector<10x16xf32>
    %cst_38 = arith.constant dense<0.000000e+00> : vector<10x10xf32>
    %78 = tpu.matmul %69, %73, %cst_38 {dimension_numbers = #tpu.dot_dimension_numbers<[1], [1], [0], [0], [0, 0, 1, 0], [], []>} : vector<10x16xf32>, vector<10x16xf32>, vector<10x10xf32> -> vector<10x10xf32>
    %cst_39 = arith.constant 2.500000e-01 : f32
    %79 = vector.broadcast %cst_39 : f32 to vector<10x10xf32>
    %80 = arith.mulf %78, %79 : vector<10x10xf32>
    %81 = arith.addf %80, %5 : vector<10x10xf32>
    %cst_40 = arith.constant dense<0xFF800000> : vector<10xf32>
    %82 = vector.multi_reduction <maximumf>, %81, %cst_40 [1] : vector<10x10xf32> to vector<10xf32>
    %83 = vector.shape_cast %82 : vector<10xf32> to vector<10x1xf32>
    %84 = vector.broadcast %83 : vector<10x1xf32> to vector<10x10xf32>
    %85 = arith.subf %81, %84 : vector<10x10xf32>
    %86 = math.exp %85 : vector<10x10xf32>
    %cst_41 = arith.constant dense<0.000000e+00> : vector<10xf32>
    %87 = vector.multi_reduction <add>, %86, %cst_41 [1] : vector<10x10xf32> to vector<10xf32>
    %88 = vector.shape_cast %87 : vector<10xf32> to vector<10x1xf32>
    %89 = tpu.reciprocal %88 {approx = true} : vector<10x1xf32> -> vector<10x1xf32>
    %90 = vector.broadcast %89 : vector<10x1xf32> to vector<10x10xf32>
    %91 = arith.mulf %86, %90 : vector<10x10xf32>
    %cst_42 = arith.constant dense<0.000000e+00> : vector<10x16xf32>
    %92 = tpu.matmul %91, %77, %cst_42 {dimension_numbers = #tpu.dot_dimension_numbers<[1], [0], [0], [1], [0, 0, 1, 1], [], []>} : vector<10x10xf32>, vector<10x16xf32>, vector<10x16xf32> -> vector<10x16xf32>
    %c416 = arith.constant 416 : index
    %c0_43 = arith.constant 0 : index
    %93 = vector.load %arg1[%c416, %c0_43] : memref<744x32xf32, #tpu.memory_space<vmem>>, vector<16x32xf32>
    %cst_44 = arith.constant dense<0.000000e+00> : vector<10x32xf32>
    %94 = tpu.matmul %92, %93, %cst_44 {dimension_numbers = #tpu.dot_dimension_numbers<[1], [0], [0], [1], [0, 0, 1, 1], [], []>} : vector<10x16xf32>, vector<16x32xf32>, vector<10x32xf32> -> vector<10x32xf32>
    %95 = arith.addf %62, %94 : vector<10x32xf32>
    %96 = arith.addf %4, %95 : vector<10x32xf32>
    %c290 = arith.constant 290 : index
    %c0_45 = arith.constant 0 : index
    %97 = vector.load %arg1[%c290, %c0_45] : memref<744x32xf32, #tpu.memory_space<vmem>>, vector<1x32xf32>
    %c291 = arith.constant 291 : index
    %c0_46 = arith.constant 0 : index
    %98 = vector.load %arg1[%c291, %c0_46] : memref<744x32xf32, #tpu.memory_space<vmem>>, vector<1x32xf32>
    %cst_47 = arith.constant dense<0.000000e+00> : vector<10xf32>
    %99 = vector.multi_reduction <add>, %96, %cst_47 [1] : vector<10x32xf32> to vector<10xf32>
    %100 = vector.shape_cast %99 : vector<10xf32> to vector<10x1xf32>
    %cst_48 = arith.constant 3.200000e+01 : f32
    %101 = vector.broadcast %cst_48 : f32 to vector<10x1xf32>
    %102 = arith.divf %100, %101 : vector<10x1xf32>
    %103 = vector.broadcast %102 : vector<10x1xf32> to vector<10x32xf32>
    %104 = arith.subf %96, %103 : vector<10x32xf32>
    %105 = arith.mulf %104, %104 : vector<10x32xf32>
    %cst_49 = arith.constant dense<0.000000e+00> : vector<10xf32>
    %106 = vector.multi_reduction <add>, %105, %cst_49 [1] : vector<10x32xf32> to vector<10xf32>
    %107 = vector.shape_cast %106 : vector<10xf32> to vector<10x1xf32>
    %cst_50 = arith.constant 3.200000e+01 : f32
    %108 = vector.broadcast %cst_50 : f32 to vector<10x1xf32>
    %109 = arith.divf %107, %108 : vector<10x1xf32>
    %cst_51 = arith.constant 9.99999997E-7 : f32
    %110 = vector.broadcast %cst_51 : f32 to vector<10x1xf32>
    %111 = arith.addf %109, %110 : vector<10x1xf32>
    %112 = math.rsqrt %111 : vector<10x1xf32>
    %113 = vector.broadcast %112 : vector<10x1xf32> to vector<10x32xf32>
    %114 = arith.mulf %104, %113 : vector<10x32xf32>
    %115 = vector.broadcast %97 : vector<1x32xf32> to vector<10x32xf32>
    %116 = arith.mulf %114, %115 : vector<10x32xf32>
    %117 = vector.broadcast %98 : vector<1x32xf32> to vector<10x32xf32>
    %118 = arith.addf %116, %117 : vector<10x32xf32>
    %c0_52 = arith.constant 0 : index
    %c0_53 = arith.constant 0 : index
    %119 = vector.load %arg2[%c0_52, %c0_53] : memref<80x64xf32, #tpu.memory_space<vmem>>, vector<32x64xf32>
    %cst_54 = arith.constant dense<0.000000e+00> : vector<10x64xf32>
    %120 = tpu.matmul %118, %119, %cst_54 {dimension_numbers = #tpu.dot_dimension_numbers<[1], [0], [0], [1], [0, 0, 1, 1], [], []>} : vector<10x32xf32>, vector<32x64xf32>, vector<10x64xf32> -> vector<10x64xf32>
    %c32 = arith.constant 32 : index
    %c0_55 = arith.constant 0 : index
    %121 = vector.load %arg2[%c32, %c0_55] : memref<80x64xf32, #tpu.memory_space<vmem>>, vector<1x64xf32>
    %122 = vector.broadcast %121 : vector<1x64xf32> to vector<10x64xf32>
    %123 = arith.addf %120, %122 : vector<10x64xf32>
    %cst_56 = arith.constant 5.000000e-01 : f32
    %124 = vector.broadcast %cst_56 : f32 to vector<10x64xf32>
    %125 = arith.mulf %124, %123 : vector<10x64xf32>
    %cst_57 = arith.constant 0.707106769 : f32
    %126 = vector.broadcast %cst_57 : f32 to vector<10x64xf32>
    %127 = arith.mulf %123, %126 : vector<10x64xf32>
    %128 = math.absf %127 : vector<10x64xf32>
    %cst_58 = arith.constant 0.327591091 : f32
    %129 = vector.broadcast %cst_58 : f32 to vector<10x64xf32>
    %130 = arith.mulf %129, %128 : vector<10x64xf32>
    %cst_59 = arith.constant 1.000000e+00 : f32
    %131 = vector.broadcast %cst_59 : f32 to vector<10x64xf32>
    %132 = arith.addf %131, %130 : vector<10x64xf32>
    %133 = tpu.reciprocal %132 {approx = true} : vector<10x64xf32> -> vector<10x64xf32>
    %cst_60 = arith.constant 1.06140542 : f32
    %134 = vector.broadcast %cst_60 : f32 to vector<10x64xf32>
    %135 = arith.mulf %133, %134 : vector<10x64xf32>
    %cst_61 = arith.constant -1.45315206 : f32
    %136 = vector.broadcast %cst_61 : f32 to vector<10x64xf32>
    %137 = arith.addf %136, %135 : vector<10x64xf32>
    %138 = arith.mulf %133, %137 : vector<10x64xf32>
    %cst_62 = arith.constant 1.42141378 : f32
    %139 = vector.broadcast %cst_62 : f32 to vector<10x64xf32>
    %140 = arith.addf %139, %138 : vector<10x64xf32>
    %141 = arith.mulf %133, %140 : vector<10x64xf32>
    %cst_63 = arith.constant -0.284496725 : f32
    %142 = vector.broadcast %cst_63 : f32 to vector<10x64xf32>
    %143 = arith.addf %142, %141 : vector<10x64xf32>
    %144 = arith.mulf %133, %143 : vector<10x64xf32>
    %cst_64 = arith.constant 0.254829586 : f32
    %145 = vector.broadcast %cst_64 : f32 to vector<10x64xf32>
    %146 = arith.addf %145, %144 : vector<10x64xf32>
    %147 = arith.mulf %133, %146 : vector<10x64xf32>
    %cst_65 = arith.constant 0.000000e+00 : f32
    %148 = vector.broadcast %cst_65 : f32 to vector<10x64xf32>
    %149 = arith.subf %148, %127 : vector<10x64xf32>
    %150 = arith.mulf %149, %127 : vector<10x64xf32>
    %151 = math.exp %150 : vector<10x64xf32>
    %152 = arith.mulf %147, %151 : vector<10x64xf32>
    %cst_66 = arith.constant 1.000000e+00 : f32
    %153 = vector.broadcast %cst_66 : f32 to vector<10x64xf32>
    %154 = arith.subf %153, %152 : vector<10x64xf32>
    %cst_67 = arith.constant 0.000000e+00 : f32
    %155 = vector.broadcast %cst_67 : f32 to vector<10x64xf32>
    %156 = arith.cmpf oge, %127, %155 : vector<10x64xf32>
    %cst_68 = arith.constant 0.000000e+00 : f32
    %157 = vector.broadcast %cst_68 : f32 to vector<10x64xf32>
    %158 = arith.subf %157, %154 : vector<10x64xf32>
    %159 = arith.select %156, %154, %158 : vector<10x64xi1>, vector<10x64xf32>
    %cst_69 = arith.constant 1.000000e+00 : f32
    %160 = vector.broadcast %cst_69 : f32 to vector<10x64xf32>
    %161 = arith.addf %160, %159 : vector<10x64xf32>
    %162 = arith.mulf %125, %161 : vector<10x64xf32>
    %c432 = arith.constant 432 : index
    %c0_70 = arith.constant 0 : index
    %163 = vector.load %arg1[%c432, %c0_70] : memref<744x32xf32, #tpu.memory_space<vmem>>, vector<64x32xf32>
    %cst_71 = arith.constant dense<0.000000e+00> : vector<10x32xf32>
    %164 = tpu.matmul %162, %163, %cst_71 {dimension_numbers = #tpu.dot_dimension_numbers<[1], [0], [0], [1], [0, 0, 1, 1], [], []>} : vector<10x64xf32>, vector<64x32xf32>, vector<10x32xf32> -> vector<10x32xf32>
    %165 = arith.addf %96, %164 : vector<10x32xf32>
    %c293 = arith.constant 293 : index
    %c0_72 = arith.constant 0 : index
    %166 = vector.load %arg1[%c293, %c0_72] : memref<744x32xf32, #tpu.memory_space<vmem>>, vector<1x32xf32>
    %167 = vector.broadcast %166 : vector<1x32xf32> to vector<10x32xf32>
    %168 = arith.addf %165, %167 : vector<10x32xf32>
    %c496 = arith.constant 496 : index
    %c0_73 = arith.constant 0 : index
    %169 = vector.load %arg1[%c496, %c0_73] : memref<744x32xf32, #tpu.memory_space<vmem>>, vector<1x32xf32>
    %c497 = arith.constant 497 : index
    %c0_74 = arith.constant 0 : index
    %170 = vector.load %arg1[%c497, %c0_74] : memref<744x32xf32, #tpu.memory_space<vmem>>, vector<1x32xf32>
    %cst_75 = arith.constant dense<0.000000e+00> : vector<10xf32>
    %171 = vector.multi_reduction <add>, %168, %cst_75 [1] : vector<10x32xf32> to vector<10xf32>
    %172 = vector.shape_cast %171 : vector<10xf32> to vector<10x1xf32>
    %cst_76 = arith.constant 3.200000e+01 : f32
    %173 = vector.broadcast %cst_76 : f32 to vector<10x1xf32>
    %174 = arith.divf %172, %173 : vector<10x1xf32>
    %175 = vector.broadcast %174 : vector<10x1xf32> to vector<10x32xf32>
    %176 = arith.subf %168, %175 : vector<10x32xf32>
    %177 = arith.mulf %176, %176 : vector<10x32xf32>
    %cst_77 = arith.constant dense<0.000000e+00> : vector<10xf32>
    %178 = vector.multi_reduction <add>, %177, %cst_77 [1] : vector<10x32xf32> to vector<10xf32>
    %179 = vector.shape_cast %178 : vector<10xf32> to vector<10x1xf32>
    %cst_78 = arith.constant 3.200000e+01 : f32
    %180 = vector.broadcast %cst_78 : f32 to vector<10x1xf32>
    %181 = arith.divf %179, %180 : vector<10x1xf32>
    %cst_79 = arith.constant 9.99999997E-7 : f32
    %182 = vector.broadcast %cst_79 : f32 to vector<10x1xf32>
    %183 = arith.addf %181, %182 : vector<10x1xf32>
    %184 = math.rsqrt %183 : vector<10x1xf32>
    %185 = vector.broadcast %184 : vector<10x1xf32> to vector<10x32xf32>
    %186 = arith.mulf %176, %185 : vector<10x32xf32>
    %187 = vector.broadcast %169 : vector<1x32xf32> to vector<10x32xf32>
    %188 = arith.mulf %186, %187 : vector<10x32xf32>
    %189 = vector.broadcast %170 : vector<1x32xf32> to vector<10x32xf32>
    %190 = arith.addf %188, %189 : vector<10x32xf32>
    %c500 = arith.constant 500 : index
    %c0_80 = arith.constant 0 : index
    %191 = vector.load %arg1[%c500, %c0_80] : memref<744x32xf32, #tpu.memory_space<vmem>>, vector<1x32xf32>
    %c502 = arith.constant 502 : index
    %c0_81 = arith.constant 0 : index
    %192 = vector.load %arg1[%c502, %c0_81] : memref<744x32xf32, #tpu.memory_space<vmem>>, vector<1x16xf32>
    %c504 = arith.constant 504 : index
    %c0_82 = arith.constant 0 : index
    %193 = vector.load %arg1[%c504, %c0_82] : memref<744x32xf32, #tpu.memory_space<vmem>>, vector<1x16xf32>
    %c506 = arith.constant 506 : index
    %c0_83 = arith.constant 0 : index
    %194 = vector.load %arg1[%c506, %c0_83] : memref<744x32xf32, #tpu.memory_space<vmem>>, vector<1x16xf32>
    %c512 = arith.constant 512 : index
    %c0_84 = arith.constant 0 : index
    %195 = vector.load %arg1[%c512, %c0_84] : memref<744x32xf32, #tpu.memory_space<vmem>>, vector<16x32xf32>
    %cst_85 = arith.constant dense<0.000000e+00> : vector<10x16xf32>
    %196 = tpu.matmul %190, %195, %cst_85 {dimension_numbers = #tpu.dot_dimension_numbers<[1], [1], [0], [0], [0, 0, 1, 0], [], []>} : vector<10x32xf32>, vector<16x32xf32>, vector<10x16xf32> -> vector<10x16xf32>
    %197 = vector.broadcast %192 : vector<1x16xf32> to vector<10x16xf32>
    %198 = arith.addf %196, %197 : vector<10x16xf32>
    %c528 = arith.constant 528 : index
    %c0_86 = arith.constant 0 : index
    %199 = vector.load %arg1[%c528, %c0_86] : memref<744x32xf32, #tpu.memory_space<vmem>>, vector<16x32xf32>
    %cst_87 = arith.constant dense<0.000000e+00> : vector<10x16xf32>
    %200 = tpu.matmul %190, %199, %cst_87 {dimension_numbers = #tpu.dot_dimension_numbers<[1], [1], [0], [0], [0, 0, 1, 0], [], []>} : vector<10x32xf32>, vector<16x32xf32>, vector<10x16xf32> -> vector<10x16xf32>
    %201 = vector.broadcast %193 : vector<1x16xf32> to vector<10x16xf32>
    %202 = arith.addf %200, %201 : vector<10x16xf32>
    %c544 = arith.constant 544 : index
    %c0_88 = arith.constant 0 : index
    %203 = vector.load %arg1[%c544, %c0_88] : memref<744x32xf32, #tpu.memory_space<vmem>>, vector<16x32xf32>
    %cst_89 = arith.constant dense<0.000000e+00> : vector<10x16xf32>
    %204 = tpu.matmul %190, %203, %cst_89 {dimension_numbers = #tpu.dot_dimension_numbers<[1], [1], [0], [0], [0, 0, 1, 0], [], []>} : vector<10x32xf32>, vector<16x32xf32>, vector<10x16xf32> -> vector<10x16xf32>
    %205 = vector.broadcast %194 : vector<1x16xf32> to vector<10x16xf32>
    %206 = arith.addf %204, %205 : vector<10x16xf32>
    %cst_90 = arith.constant dense<0.000000e+00> : vector<10x10xf32>
    %207 = tpu.matmul %198, %202, %cst_90 {dimension_numbers = #tpu.dot_dimension_numbers<[1], [1], [0], [0], [0, 0, 1, 0], [], []>} : vector<10x16xf32>, vector<10x16xf32>, vector<10x10xf32> -> vector<10x10xf32>
    %cst_91 = arith.constant 2.500000e-01 : f32
    %208 = vector.broadcast %cst_91 : f32 to vector<10x10xf32>
    %209 = arith.mulf %207, %208 : vector<10x10xf32>
    %210 = arith.addf %209, %5 : vector<10x10xf32>
    %cst_92 = arith.constant dense<0xFF800000> : vector<10xf32>
    %211 = vector.multi_reduction <maximumf>, %210, %cst_92 [1] : vector<10x10xf32> to vector<10xf32>
    %212 = vector.shape_cast %211 : vector<10xf32> to vector<10x1xf32>
    %213 = vector.broadcast %212 : vector<10x1xf32> to vector<10x10xf32>
    %214 = arith.subf %210, %213 : vector<10x10xf32>
    %215 = math.exp %214 : vector<10x10xf32>
    %cst_93 = arith.constant dense<0.000000e+00> : vector<10xf32>
    %216 = vector.multi_reduction <add>, %215, %cst_93 [1] : vector<10x10xf32> to vector<10xf32>
    %217 = vector.shape_cast %216 : vector<10xf32> to vector<10x1xf32>
    %218 = tpu.reciprocal %217 {approx = true} : vector<10x1xf32> -> vector<10x1xf32>
    %219 = vector.broadcast %218 : vector<10x1xf32> to vector<10x10xf32>
    %220 = arith.mulf %215, %219 : vector<10x10xf32>
    %cst_94 = arith.constant dense<0.000000e+00> : vector<10x16xf32>
    %221 = tpu.matmul %220, %206, %cst_94 {dimension_numbers = #tpu.dot_dimension_numbers<[1], [0], [0], [1], [0, 0, 1, 1], [], []>} : vector<10x10xf32>, vector<10x16xf32>, vector<10x16xf32> -> vector<10x16xf32>
    %c560 = arith.constant 560 : index
    %c0_95 = arith.constant 0 : index
    %222 = vector.load %arg1[%c560, %c0_95] : memref<744x32xf32, #tpu.memory_space<vmem>>, vector<16x32xf32>
    %cst_96 = arith.constant dense<0.000000e+00> : vector<10x32xf32>
    %223 = tpu.matmul %221, %222, %cst_96 {dimension_numbers = #tpu.dot_dimension_numbers<[1], [0], [0], [1], [0, 0, 1, 1], [], []>} : vector<10x16xf32>, vector<16x32xf32>, vector<10x32xf32> -> vector<10x32xf32>
    %224 = vector.broadcast %191 : vector<1x32xf32> to vector<10x32xf32>
    %225 = arith.addf %224, %223 : vector<10x32xf32>
    %c503 = arith.constant 503 : index
    %c0_97 = arith.constant 0 : index
    %226 = vector.load %arg1[%c503, %c0_97] : memref<744x32xf32, #tpu.memory_space<vmem>>, vector<1x16xf32>
    %c505 = arith.constant 505 : index
    %c0_98 = arith.constant 0 : index
    %227 = vector.load %arg1[%c505, %c0_98] : memref<744x32xf32, #tpu.memory_space<vmem>>, vector<1x16xf32>
    %c507 = arith.constant 507 : index
    %c0_99 = arith.constant 0 : index
    %228 = vector.load %arg1[%c507, %c0_99] : memref<744x32xf32, #tpu.memory_space<vmem>>, vector<1x16xf32>
    %c576 = arith.constant 576 : index
    %c0_100 = arith.constant 0 : index
    %229 = vector.load %arg1[%c576, %c0_100] : memref<744x32xf32, #tpu.memory_space<vmem>>, vector<16x32xf32>
    %cst_101 = arith.constant dense<0.000000e+00> : vector<10x16xf32>
    %230 = tpu.matmul %190, %229, %cst_101 {dimension_numbers = #tpu.dot_dimension_numbers<[1], [1], [0], [0], [0, 0, 1, 0], [], []>} : vector<10x32xf32>, vector<16x32xf32>, vector<10x16xf32> -> vector<10x16xf32>
    %231 = vector.broadcast %226 : vector<1x16xf32> to vector<10x16xf32>
    %232 = arith.addf %230, %231 : vector<10x16xf32>
    %c592 = arith.constant 592 : index
    %c0_102 = arith.constant 0 : index
    %233 = vector.load %arg1[%c592, %c0_102] : memref<744x32xf32, #tpu.memory_space<vmem>>, vector<16x32xf32>
    %cst_103 = arith.constant dense<0.000000e+00> : vector<10x16xf32>
    %234 = tpu.matmul %190, %233, %cst_103 {dimension_numbers = #tpu.dot_dimension_numbers<[1], [1], [0], [0], [0, 0, 1, 0], [], []>} : vector<10x32xf32>, vector<16x32xf32>, vector<10x16xf32> -> vector<10x16xf32>
    %235 = vector.broadcast %227 : vector<1x16xf32> to vector<10x16xf32>
    %236 = arith.addf %234, %235 : vector<10x16xf32>
    %c608 = arith.constant 608 : index
    %c0_104 = arith.constant 0 : index
    %237 = vector.load %arg1[%c608, %c0_104] : memref<744x32xf32, #tpu.memory_space<vmem>>, vector<16x32xf32>
    %cst_105 = arith.constant dense<0.000000e+00> : vector<10x16xf32>
    %238 = tpu.matmul %190, %237, %cst_105 {dimension_numbers = #tpu.dot_dimension_numbers<[1], [1], [0], [0], [0, 0, 1, 0], [], []>} : vector<10x32xf32>, vector<16x32xf32>, vector<10x16xf32> -> vector<10x16xf32>
    %239 = vector.broadcast %228 : vector<1x16xf32> to vector<10x16xf32>
    %240 = arith.addf %238, %239 : vector<10x16xf32>
    %cst_106 = arith.constant dense<0.000000e+00> : vector<10x10xf32>
    %241 = tpu.matmul %232, %236, %cst_106 {dimension_numbers = #tpu.dot_dimension_numbers<[1], [1], [0], [0], [0, 0, 1, 0], [], []>} : vector<10x16xf32>, vector<10x16xf32>, vector<10x10xf32> -> vector<10x10xf32>
    %cst_107 = arith.constant 2.500000e-01 : f32
    %242 = vector.broadcast %cst_107 : f32 to vector<10x10xf32>
    %243 = arith.mulf %241, %242 : vector<10x10xf32>
    %244 = arith.addf %243, %5 : vector<10x10xf32>
    %cst_108 = arith.constant dense<0xFF800000> : vector<10xf32>
    %245 = vector.multi_reduction <maximumf>, %244, %cst_108 [1] : vector<10x10xf32> to vector<10xf32>
    %246 = vector.shape_cast %245 : vector<10xf32> to vector<10x1xf32>
    %247 = vector.broadcast %246 : vector<10x1xf32> to vector<10x10xf32>
    %248 = arith.subf %244, %247 : vector<10x10xf32>
    %249 = math.exp %248 : vector<10x10xf32>
    %cst_109 = arith.constant dense<0.000000e+00> : vector<10xf32>
    %250 = vector.multi_reduction <add>, %249, %cst_109 [1] : vector<10x10xf32> to vector<10xf32>
    %251 = vector.shape_cast %250 : vector<10xf32> to vector<10x1xf32>
    %252 = tpu.reciprocal %251 {approx = true} : vector<10x1xf32> -> vector<10x1xf32>
    %253 = vector.broadcast %252 : vector<10x1xf32> to vector<10x10xf32>
    %254 = arith.mulf %249, %253 : vector<10x10xf32>
    %cst_110 = arith.constant dense<0.000000e+00> : vector<10x16xf32>
    %255 = tpu.matmul %254, %240, %cst_110 {dimension_numbers = #tpu.dot_dimension_numbers<[1], [0], [0], [1], [0, 0, 1, 1], [], []>} : vector<10x10xf32>, vector<10x16xf32>, vector<10x16xf32> -> vector<10x16xf32>
    %c624 = arith.constant 624 : index
    %c0_111 = arith.constant 0 : index
    %256 = vector.load %arg1[%c624, %c0_111] : memref<744x32xf32, #tpu.memory_space<vmem>>, vector<16x32xf32>
    %cst_112 = arith.constant dense<0.000000e+00> : vector<10x32xf32>
    %257 = tpu.matmul %255, %256, %cst_112 {dimension_numbers = #tpu.dot_dimension_numbers<[1], [0], [0], [1], [0, 0, 1, 1], [], []>} : vector<10x16xf32>, vector<16x32xf32>, vector<10x32xf32> -> vector<10x32xf32>
    %258 = arith.addf %225, %257 : vector<10x32xf32>
    %259 = arith.addf %168, %258 : vector<10x32xf32>
    %c498 = arith.constant 498 : index
    %c0_113 = arith.constant 0 : index
    %260 = vector.load %arg1[%c498, %c0_113] : memref<744x32xf32, #tpu.memory_space<vmem>>, vector<1x32xf32>
    %c499 = arith.constant 499 : index
    %c0_114 = arith.constant 0 : index
    %261 = vector.load %arg1[%c499, %c0_114] : memref<744x32xf32, #tpu.memory_space<vmem>>, vector<1x32xf32>
    %cst_115 = arith.constant dense<0.000000e+00> : vector<10xf32>
    %262 = vector.multi_reduction <add>, %259, %cst_115 [1] : vector<10x32xf32> to vector<10xf32>
    %263 = vector.shape_cast %262 : vector<10xf32> to vector<10x1xf32>
    %cst_116 = arith.constant 3.200000e+01 : f32
    %264 = vector.broadcast %cst_116 : f32 to vector<10x1xf32>
    %265 = arith.divf %263, %264 : vector<10x1xf32>
    %266 = vector.broadcast %265 : vector<10x1xf32> to vector<10x32xf32>
    %267 = arith.subf %259, %266 : vector<10x32xf32>
    %268 = arith.mulf %267, %267 : vector<10x32xf32>
    %cst_117 = arith.constant dense<0.000000e+00> : vector<10xf32>
    %269 = vector.multi_reduction <add>, %268, %cst_117 [1] : vector<10x32xf32> to vector<10xf32>
    %270 = vector.shape_cast %269 : vector<10xf32> to vector<10x1xf32>
    %cst_118 = arith.constant 3.200000e+01 : f32
    %271 = vector.broadcast %cst_118 : f32 to vector<10x1xf32>
    %272 = arith.divf %270, %271 : vector<10x1xf32>
    %cst_119 = arith.constant 9.99999997E-7 : f32
    %273 = vector.broadcast %cst_119 : f32 to vector<10x1xf32>
    %274 = arith.addf %272, %273 : vector<10x1xf32>
    %275 = math.rsqrt %274 : vector<10x1xf32>
    %276 = vector.broadcast %275 : vector<10x1xf32> to vector<10x32xf32>
    %277 = arith.mulf %267, %276 : vector<10x32xf32>
    %278 = vector.broadcast %260 : vector<1x32xf32> to vector<10x32xf32>
    %279 = arith.mulf %277, %278 : vector<10x32xf32>
    %280 = vector.broadcast %261 : vector<1x32xf32> to vector<10x32xf32>
    %281 = arith.addf %279, %280 : vector<10x32xf32>
    %c40 = arith.constant 40 : index
    %c0_120 = arith.constant 0 : index
    %282 = vector.load %arg2[%c40, %c0_120] : memref<80x64xf32, #tpu.memory_space<vmem>>, vector<32x64xf32>
    %cst_121 = arith.constant dense<0.000000e+00> : vector<10x64xf32>
    %283 = tpu.matmul %281, %282, %cst_121 {dimension_numbers = #tpu.dot_dimension_numbers<[1], [0], [0], [1], [0, 0, 1, 1], [], []>} : vector<10x32xf32>, vector<32x64xf32>, vector<10x64xf32> -> vector<10x64xf32>
    %c72 = arith.constant 72 : index
    %c0_122 = arith.constant 0 : index
    %284 = vector.load %arg2[%c72, %c0_122] : memref<80x64xf32, #tpu.memory_space<vmem>>, vector<1x64xf32>
    %285 = vector.broadcast %284 : vector<1x64xf32> to vector<10x64xf32>
    %286 = arith.addf %283, %285 : vector<10x64xf32>
    %cst_123 = arith.constant 5.000000e-01 : f32
    %287 = vector.broadcast %cst_123 : f32 to vector<10x64xf32>
    %288 = arith.mulf %287, %286 : vector<10x64xf32>
    %cst_124 = arith.constant 0.707106769 : f32
    %289 = vector.broadcast %cst_124 : f32 to vector<10x64xf32>
    %290 = arith.mulf %286, %289 : vector<10x64xf32>
    %291 = math.absf %290 : vector<10x64xf32>
    %cst_125 = arith.constant 0.327591091 : f32
    %292 = vector.broadcast %cst_125 : f32 to vector<10x64xf32>
    %293 = arith.mulf %292, %291 : vector<10x64xf32>
    %cst_126 = arith.constant 1.000000e+00 : f32
    %294 = vector.broadcast %cst_126 : f32 to vector<10x64xf32>
    %295 = arith.addf %294, %293 : vector<10x64xf32>
    %296 = tpu.reciprocal %295 {approx = true} : vector<10x64xf32> -> vector<10x64xf32>
    %cst_127 = arith.constant 1.06140542 : f32
    %297 = vector.broadcast %cst_127 : f32 to vector<10x64xf32>
    %298 = arith.mulf %296, %297 : vector<10x64xf32>
    %cst_128 = arith.constant -1.45315206 : f32
    %299 = vector.broadcast %cst_128 : f32 to vector<10x64xf32>
    %300 = arith.addf %299, %298 : vector<10x64xf32>
    %301 = arith.mulf %296, %300 : vector<10x64xf32>
    %cst_129 = arith.constant 1.42141378 : f32
    %302 = vector.broadcast %cst_129 : f32 to vector<10x64xf32>
    %303 = arith.addf %302, %301 : vector<10x64xf32>
    %304 = arith.mulf %296, %303 : vector<10x64xf32>
    %cst_130 = arith.constant -0.284496725 : f32
    %305 = vector.broadcast %cst_130 : f32 to vector<10x64xf32>
    %306 = arith.addf %305, %304 : vector<10x64xf32>
    %307 = arith.mulf %296, %306 : vector<10x64xf32>
    %cst_131 = arith.constant 0.254829586 : f32
    %308 = vector.broadcast %cst_131 : f32 to vector<10x64xf32>
    %309 = arith.addf %308, %307 : vector<10x64xf32>
    %310 = arith.mulf %296, %309 : vector<10x64xf32>
    %cst_132 = arith.constant 0.000000e+00 : f32
    %311 = vector.broadcast %cst_132 : f32 to vector<10x64xf32>
    %312 = arith.subf %311, %290 : vector<10x64xf32>
    %313 = arith.mulf %312, %290 : vector<10x64xf32>
    %314 = math.exp %313 : vector<10x64xf32>
    %315 = arith.mulf %310, %314 : vector<10x64xf32>
    %cst_133 = arith.constant 1.000000e+00 : f32
    %316 = vector.broadcast %cst_133 : f32 to vector<10x64xf32>
    %317 = arith.subf %316, %315 : vector<10x64xf32>
    %cst_134 = arith.constant 0.000000e+00 : f32
    %318 = vector.broadcast %cst_134 : f32 to vector<10x64xf32>
    %319 = arith.cmpf oge, %290, %318 : vector<10x64xf32>
    %cst_135 = arith.constant 0.000000e+00 : f32
    %320 = vector.broadcast %cst_135 : f32 to vector<10x64xf32>
    %321 = arith.subf %320, %317 : vector<10x64xf32>
    %322 = arith.select %319, %317, %321 : vector<10x64xi1>, vector<10x64xf32>
    %cst_136 = arith.constant 1.000000e+00 : f32
    %323 = vector.broadcast %cst_136 : f32 to vector<10x64xf32>
    %324 = arith.addf %323, %322 : vector<10x64xf32>
    %325 = arith.mulf %288, %324 : vector<10x64xf32>
    %c640 = arith.constant 640 : index
    %c0_137 = arith.constant 0 : index
    %326 = vector.load %arg1[%c640, %c0_137] : memref<744x32xf32, #tpu.memory_space<vmem>>, vector<64x32xf32>
    %cst_138 = arith.constant dense<0.000000e+00> : vector<10x32xf32>
    %327 = tpu.matmul %325, %326, %cst_138 {dimension_numbers = #tpu.dot_dimension_numbers<[1], [0], [0], [1], [0, 0, 1, 1], [], []>} : vector<10x64xf32>, vector<64x32xf32>, vector<10x32xf32> -> vector<10x32xf32>
    %328 = arith.addf %259, %327 : vector<10x32xf32>
    %c501 = arith.constant 501 : index
    %c0_139 = arith.constant 0 : index
    %329 = vector.load %arg1[%c501, %c0_139] : memref<744x32xf32, #tpu.memory_space<vmem>>, vector<1x32xf32>
    %330 = vector.broadcast %329 : vector<1x32xf32> to vector<10x32xf32>
    %331 = arith.addf %328, %330 : vector<10x32xf32>
    %c704 = arith.constant 704 : index
    %c0_140 = arith.constant 0 : index
    %332 = vector.load %arg1[%c704, %c0_140] : memref<744x32xf32, #tpu.memory_space<vmem>>, vector<1x32xf32>
    %c705 = arith.constant 705 : index
    %c0_141 = arith.constant 0 : index
    %333 = vector.load %arg1[%c705, %c0_141] : memref<744x32xf32, #tpu.memory_space<vmem>>, vector<1x32xf32>
    %cst_142 = arith.constant dense<0.000000e+00> : vector<10xf32>
    %334 = vector.multi_reduction <add>, %331, %cst_142 [1] : vector<10x32xf32> to vector<10xf32>
    %335 = vector.shape_cast %334 : vector<10xf32> to vector<10x1xf32>
    %cst_143 = arith.constant 3.200000e+01 : f32
    %336 = vector.broadcast %cst_143 : f32 to vector<10x1xf32>
    %337 = arith.divf %335, %336 : vector<10x1xf32>
    %338 = vector.broadcast %337 : vector<10x1xf32> to vector<10x32xf32>
    %339 = arith.subf %331, %338 : vector<10x32xf32>
    %340 = arith.mulf %339, %339 : vector<10x32xf32>
    %cst_144 = arith.constant dense<0.000000e+00> : vector<10xf32>
    %341 = vector.multi_reduction <add>, %340, %cst_144 [1] : vector<10x32xf32> to vector<10xf32>
    %342 = vector.shape_cast %341 : vector<10xf32> to vector<10x1xf32>
    %cst_145 = arith.constant 3.200000e+01 : f32
    %343 = vector.broadcast %cst_145 : f32 to vector<10x1xf32>
    %344 = arith.divf %342, %343 : vector<10x1xf32>
    %cst_146 = arith.constant 9.99999997E-7 : f32
    %345 = vector.broadcast %cst_146 : f32 to vector<10x1xf32>
    %346 = arith.addf %344, %345 : vector<10x1xf32>
    %347 = math.rsqrt %346 : vector<10x1xf32>
    %348 = vector.broadcast %347 : vector<10x1xf32> to vector<10x32xf32>
    %349 = arith.mulf %339, %348 : vector<10x32xf32>
    %350 = vector.broadcast %332 : vector<1x32xf32> to vector<10x32xf32>
    %351 = arith.mulf %349, %350 : vector<10x32xf32>
    %352 = vector.broadcast %333 : vector<1x32xf32> to vector<10x32xf32>
    %353 = arith.addf %351, %352 : vector<10x32xf32>
    %c0_147 = arith.constant 0 : index
    %c0_148 = arith.constant 0 : index
    %354 = vector.load %arg3[%c0_147, %c0_148] : memref<10x32xf32, #tpu.memory_space<vmem>>, vector<10x32xf32>
    tpu.vector_store %arg3[%c0_147, %c0_148], %353 {strides = array<i32>} : memref<10x32xf32, #tpu.memory_space<vmem>>, vector<10x32xf32>,
    %355 = vector.extract_strided_slice %353 {offsets = [0, 0], sizes = [1, 32], strides = [1, 1]} : vector<10x32xf32> to vector<1x32xf32>
    %356 = vector.extract_strided_slice %353 {offsets = [5, 0], sizes = [1, 32], strides = [1, 1]} : vector<10x32xf32> to vector<1x32xf32>
    %357 = tpu.concatenate %355, %356 in 0 : vector<1x32xf32>, vector<1x32xf32> -> vector<2x32xf32>
    %c712 = arith.constant 712 : index
    %c0_149 = arith.constant 0 : index
    %358 = vector.load %arg1[%c712, %c0_149] : memref<744x32xf32, #tpu.memory_space<vmem>>, vector<32x32xf32>
    %cst_150 = arith.constant dense<0.000000e+00> : vector<2x32xf32>
    %359 = tpu.matmul %357, %358, %cst_150 {dimension_numbers = #tpu.dot_dimension_numbers<[1], [0], [0], [1], [0, 0, 1, 1], [], []>} : vector<2x32xf32>, vector<32x32xf32>, vector<2x32xf32> -> vector<2x32xf32>
    %c706 = arith.constant 706 : index
    %c0_151 = arith.constant 0 : index
    %360 = vector.load %arg1[%c706, %c0_151] : memref<744x32xf32, #tpu.memory_space<vmem>>, vector<1x32xf32>
    %361 = vector.broadcast %360 : vector<1x32xf32> to vector<2x32xf32>
    %362 = arith.addf %359, %361 : vector<2x32xf32>
    %363 = math.tanh %362 : vector<2x32xf32>
    %c0_152 = arith.constant 0 : index
    %c0_153 = arith.constant 0 : index
    %364 = vector.load %arg4[%c0_152, %c0_153] : memref<2x32xf32, #tpu.memory_space<vmem>>, vector<2x32xf32>
    tpu.vector_store %arg4[%c0_152, %c0_153], %363 {strides = array<i32>} : memref<2x32xf32, #tpu.memory_space<vmem>>, vector<2x32xf32>,
    return
  }
}

</mosaic_0001>

<bundles_post_ra>
// kernel: vision_encoder.1
= control target key start
LH: loop header
LB: loop body
LE: loop exit
PB: predicated region body
PF: predicated region fallthrough
CT: control target
= control target key end

     0   :  { %s4711_s0 = inlined_call_operand.vmem [shape: f32[10,256], index: 0, kind: input, shape index: {}]   ;;  %s4712_s1 = inlined_call_operand.vmem [shape: f32[744,32], index: 1, kind: input, shape index: {}]   ;;  %s4713_s2 = inlined_call_operand.vmem [shape: f32[80,64], index: 2, kind: input, shape index: {}]   ;;  %s4714_s3 = inlined_call_operand.vmem [shape: f32[10,32], index: 3, kind: output, shape index: {0}]   ;;  %s4715_s4 = inlined_call_operand.hbm [shape: f32[2,32], index: 4, kind: output, shape index: {1}]  }
   0x1   :  { %v33_v0 = vld [vmem:[%s4712_s1 + $0x80] sm:$0xff]  ;;  %v34_v1 = vld [vmem:[%s4712_s1 + $0x88] sm:$0xff]  ;;  %v35_v5 = vld [vmem:[%s4712_s1 + $0x90] sm:$0xff] }
   0x2   :  { %v17_v2 = vld [vmem:[%s4712_s1] sm:$0xff]  ;;  %v3671_v3 = vpack.c.bf16 %v34_v1, %v33_v0  ;;  %v18_v4 = vld [vmem:[%s4712_s1 + $0x8] sm:$0xff]  ;;  %v36_v6 = vld [vmem:[%s4712_s1 + $0x98] sm:$0xff] }
   0x3   :  { %v3673_v7 = vpack.c.bf16 %v18_v4, %v17_v2  ;;  %v3675_v8 = vpack.c.bf16 %v36_v6, %v35_v5  ;;  %v19_v9 = vld [vmem:[%s4712_s1 + $0x10] sm:$0xff]  ;;  %v20_v10 = vld [vmem:[%s4712_s1 + $0x18] sm:$0xff]  ;;  %v37_v11 = vld [vmem:[%s4712_s1 + $0xa0] sm:$0xff] }
   0x4   :  { %3672 = vmatprep.subr.bf16.mxu0 %v3671_v3  ;;  %v38_v12 = vld [vmem:[%s4712_s1 + $0xa8] sm:$0xff]  ;;  %v3677_v13 = vpack.c.bf16 %v20_v10, %v19_v9  ;;  %v21_v15 = vld [vmem:[%s4712_s1 + $0x20] sm:$0xff]  ;;  %v39_v17 = vld [vmem:[%s4712_s1 + $0xb0] sm:$0xff] }
   0x5   :  { %3674 = vmatpush3.bf16.msra.mxu0 %v3673_v7  ;;  %v3679_v14 = vpack.c.bf16 %v38_v12, %v37_v11  ;;  %v22_v16 = vld [vmem:[%s4712_s1 + $0x28] sm:$0xff]  ;;  %v40_v18 = vld [vmem:[%s4712_s1 + $0xb8] sm:$0xff]  ;;  %v23_v21 = vld [vmem:[%s4712_s1 + $0x30] sm:$0xff] }
   0x6   :  { %3676 = vmatprep.subr.bf16.mxu0 %v3675_v8  ;;  %v3681_v19 = vpack.c.bf16 %v22_v16, %v21_v15  ;;  %v3683_v20 = vpack.c.bf16 %v40_v18, %v39_v17  ;;  %v24_v22 = vld [vmem:[%s4712_s1 + $0x38] sm:$0xff]  ;;  %v41_v23 = vld [vmem:[%s4712_s1 + $0xc0] sm:$0xff]  ;;  %v42_v24 = vld [vmem:[%s4712_s1 + $0xc8] sm:$0xff] }
   0x7   :  { %v50_v25 = vld [vmem:[%s4711_s0 + $0x8] sm:$0xff]  ;;  %v3685_v26 = vpack.c.bf16 %v24_v22, %v23_v21 }
   0x8   :  { %119 = vmatprep.mubr.f32.mxu0 %v50_v25 }
   0x9   :  { %3678 = vmatpush3.bf16.msra.mxu0 %v3677_v13 }
   0xa   :  { %3680 = vmatprep.subr.bf16.mxu0 %v3679_v14 }
   0xd   :  { %3682 = vmatpush3.bf16.msra.mxu0 %v3681_v19 }
   0xe   :  { %10 = vsyncpa [#allocation3], 0  ;;  %3684 = vmatprep.subr.bf16.mxu0 %v3683_v20  ;;  %v3687_v27 = vpack.c.bf16 %v42_v24, %v41_v23  ;;  %v25_v28 = vld [vmem:[%s4712_s1 + $0x40] sm:$0xff]  ;;  %v26_v29 = vld [vmem:[%s4712_s1 + $0x48] sm:$0xff]  ;;  %vm134_vm0 = vcmask 261120   ;;  %vm138_vm1 = vcmask 254976  }
   0xf   :  { %v43_v30 = vld [vmem:[%s4712_s1 + $0xd0] sm:$0xff]  ;;  %v44_v31 = vld [vmem:[%s4712_s1 + $0xd8] sm:$0xff]  ;;  %v3689_v32 = vpack.c.bf16 %v26_v29, %v25_v28  ;;  %v45_v36 = vld [vmem:[%s4712_s1 + $0xe0] sm:$0xff]  ;;  %vm446_vm3 = vcmask 130048   ;;  %vm568_vm5 = vcmask 1041408   ;;  %vm4000_vm6 = vmmov 1  }
  0x10   :  { %v3691_v33 = vpack.c.bf16 %v44_v31, %v43_v30  ;;  %v27_v34 = vld [vmem:[%s4712_s1 + $0x50] sm:$0xff]  ;;  %v28_v35 = vld [vmem:[%s4712_s1 + $0x58] sm:$0xff]  ;;  %v46_v37 = vld [vmem:[%s4712_s1 + $0xe8] sm:$0xff]  ;;  %vm542_vm8 = vcmask 74752   ;;  %vm538_vm9 = vcmask 80896   ;;  %vm1474_vm12 = vcmask 523264  }
  0x11   :  { %3686 = vmatpush3.bf16.msra.mxu0 %v3685_v26  ;;  %v3693_v38 = vpack.c.bf16 %v28_v35, %v27_v34  ;;  %v3695_v39 = vpack.c.bf16 %v46_v37, %v45_v36  ;;  %v29_v40 = vld [vmem:[%s4712_s1 + $0x60] sm:$0xff]  ;;  %v30_v41 = vld [vmem:[%s4712_s1 + $0x68] sm:$0xff]  ;;  %v47_v42 = vld [vmem:[%s4712_s1 + $0xf0] sm:$0xff]  ;;  %vm4002_vm15 = vmmov 0   ;;  %s4004_s9 = smov [#allocation2]  }
  0x12   :  { %3688 = vmatprep.subr.bf16.mxu0 %v3687_v27  ;;  %v48_v43 = vld [vmem:[%s4712_s1 + $0xf8] sm:$0xff]  ;;  %v3697_v44 = vpack.c.bf16 %v30_v41, %v29_v40  ;;  %v31_v46 = vld [vmem:[%s4712_s1 + $0x70] sm:$0xff]  ;;  %v49_v49 = vld [vmem:[%s4711_s0] sm:$0xff]  ;;  %s3129_s10 = sshll.u32 %s4004_s9, 4  ;;  %s3130_s10 = int_to_ptr.vmem [resolvable:$true] %s3129_s10 }
  0x13   :  { %v3699_v45 = vpack.c.bf16 %v48_v43, %v47_v42  ;;  %v32_v47 = vld [vmem:[%s4712_s1 + $0x78] sm:$0xff]  ;;  %v51_v51 = vld [vmem:[%s4711_s0 + $0x10] sm:$0x3]  ;;  %v53_v53 = vld [vmem:[%s4712_s1 + $0x100] sm:$0xff]  ;;  %s3976_s11 = scalar_lea.vmem %s3130_s10, 32  ;;  %p3981_p1 = scmp.lt.s32.totalorder %s3130_s10, %s3130_s10 }
  0x14   :  { %v3701_v48 = vpack.c.bf16 %v32_v47, %v31_v46  ;;  %v52_v50 = vld [vmem:[%s4711_s0 + $0x18] sm:$0x3]  ;;  %v54_v58 = vld [vmem:[%s4712_s1 + $0x108] sm:$0x3]  ;;  %v179_v10 = vld [vmem:[%s4712_s1 + $0x130] sm:$0xff]  ;;  %p3977_p0 = scmp.ne.s32.totalorder %s3130_s10, %s3976_s11  ;;  %p3982_p2 = scmp.lt.s32.totalorder %s3976_s11, %s3976_s11 }
  0x15   :  { %3690 = vmatpush3.bf16.msra.mxu0 %v3689_v32  ;;  %v180_v11 = vld [vmem:[%s4712_s1 + $0x138] sm:$0xff]  ;;  %vm4164_vm2 = vmpackc.low %vm134_vm0, %vm134_vm0  ;;  %v272_v14 = vld [vmem:[%s4712_s1 + $0x140] sm:$0xff] }
  0x16   :  { %3692 = vmatprep.subr.bf16.mxu0 %v3691_v33  ;;  %v3703_v12 = vpack.c.bf16 %v180_v11, %v179_v10  ;;  %v273_v15 = vld [vmem:[%s4712_s1 + $0x148] sm:$0xff]  ;;  %v3139_v24 = vld [vmem:[%s4712_s1 + $0x120] ss:$0 sm:$0xff]  ;;  %v3140_v26 = vld [vmem:[%s4712_s1 + $0x121] ss:$0 sm:$0xff]  ;;  %p3983_p3 = por %p3982_p2, %p3981_p1 }
  0x17   :  { %v3709_v16 = vpack.c.bf16 %v273_v15, %v272_v14  ;;  %v359_v31 = vld [vmem:[%s4712_s1 + $0x150] sm:$0xff]  ;;  %v360_v32 = vld [vmem:[%s4712_s1 + $0x158] sm:$0xff]  ;;  %v3141_v36 = vld [vmem:[%s4712_s1 + $0x126] ss:$0 sm:$0xff] }
  0x18   :  { %3705 = vmatprep.subr.msk.bf16.mxu1 %vm4164_vm2, %v3703_v12  ;;  %v3715_v35 = vpack.c.bf16 %v360_v32, %v359_v31  ;;  %v3146_v40 = vld [vmem:[%s4712_s1 + $0x128] ss:$0 sm:$0xff]  ;;  %vm4223_vm4 = vmpackc.low %vm446_vm3, %vm446_vm3  ;;  %v3151_v47 = vld [vmem:[%s4712_s1 + $0x12a] ss:$0 sm:$0xff]  ;;  %p3984_p4 = pnand %p3983_p3, %p3977_p0 }
  0x19   :  { %3694 = vmatpush3.bf16.msra.mxu0 %v3693_v38  ;;  %3708 = vmatpush3.bf16.xpose.msk.msra.mxu1 %vm4164_vm2, %v3703_v12  ;;  %vm4234_vm7 = vmpackc.low %vm568_vm5, %vm4000_vm6  ;;  %v739_v14 = vld [vmem:[%s4712_s1 + $0x170] sm:$0xff]  ;;  %v740_v15 = vld [vmem:[%s4712_s1 + $0x178] sm:$0xff] }
  0x1a   :  { %3696 = vmatprep.subr.bf16.mxu0 %v3695_v39  ;;  %3711 = vmatprep.subr.msk.bf16.mxu1 %vm4164_vm2, %v3709_v16  ;;  %v827_v31 = vld [vmem:[%s4712_s1 + $0x188] sm:$0xff] }
  0x1d   :  { %3698 = vmatpush3.bf16.msra.mxu0 %v3697_v44 }
  0x1e   :  { %3700 = vmatprep.subr.bf16.mxu0 %v3699_v45 }
  0x21   :  { %3702 = vmatpush3.bf16.msra.mxu0 %v3701_v48 }
  0x24   :  { %120 = vmatmul.mubr.f32.vlgmr.msra.gmra.mrb[0].mxu0 %v49_v49 }
  0x25   :  { %124 = vmatprep.mubr.f32.mxu0 %v52_v50 }
  0x28   :  { %125 = vmatmul.mubr.f32.gmra.mrb[2].mxu0 %v51_v51 }
  0xf7   :  { %v3293_v52 = vpop.f32.mrb[0].mxu0 }
  0xf8   :  { %v3294_v54 = vpop.f32.mrb[1].mxu0 }
  0xf9   :  { %v3295_v55 = vadd.f32 %v3294_v54, %v3293_v52  ;;  %v2073_v52 = vld [vmem:[%s4712_s1 + $0x230] sm:$0xff] }
  0xfb   :  { %v4141_v56 = vadd.f32 %v3295_v55, %v53_v53  ;;  %v3296_v57 = vpop.f32.mrb[2].mxu0 }
  0xfc   :  { %v3297_v59 = vpop.f32.mrb[3].mxu0 }
  0xfd   :  { %v3298_v60 = vadd.f32 %v3297_v59, %v3296_v57  ;;  %v135_v61 = vsel %vm134_vm0, %v4141_v56, 0.0  ;;  %v4246_v57 = vld [vmem:[%s4712_s1 + $0x118] sm:$0x3] }
  0xfe   :  { %136 = vadd.xlane.f32.xlu0 %v135_v61 }
  0xff   :  { %v4148_v62 = vadd.f32 %v3298_v60, %v54_v58  ;;  %v4251_v60 = vld [vmem:[%s4712_s1 + $0x110] sm:$0xff] }
 0x101   :  { %v139_v63 = vsel %vm138_vm1, %v4148_v62, 0.0 }
 0x102   :  { %140 = vadd.xlane.f32.xlu0 %v139_v63 }
 0x18b   :  { %v137_v0 = vpop.xlane.xlu0 %136 }
 0x18c   :  { %v143_v1 = vmul.f32 0.03125, %v137_v0 }
 0x18e   :  { %v145_v2 = vsub.f32 %v4141_v56, %v143_v1 }
 0x18f   :  { %v141_v3 = vpop.xlane.xlu0 %140 }
 0x190   :  { %v144_v4 = vmul.f32 0.03125, %v141_v3  ;;  %v147_v5 = vmul.f32 %v145_v2, %v145_v2 }
 0x192   :  { %v146_v6 = vsub.f32 %v4148_v62, %v144_v4  ;;  %v149_v7 = vsel %vm134_vm0, %v147_v5, 0.0 }
 0x193   :  { %150 = vadd.xlane.f32.xlu1 %v149_v7 }
 0x194   :  { %v148_v8 = vmul.f32 %v146_v6, %v146_v6 }
 0x196   :  { %v152_v9 = vsel %vm138_vm1, %v148_v8, 0.0 }
 0x197   :  { %153 = vadd.xlane.f32.xlu1 %v152_v9 }
 0x220   :  { %v151_v17 = vpop.xlane.xlu1 %150 }
 0x221   :  { %v155_v18 = vmul.f32 0.03125, %v151_v17  ;;  %v647_v17 = vld [vmem:[%s4712_s1 + $0x160] sm:$0xff] }
 0x223   :  { %v157_v19 = vadd.f32 1e-06, %v155_v18  ;;  %v648_v18 = vld [vmem:[%s4712_s1 + $0x168] sm:$0xff] }
 0x224   :  { %v154_v20 = vpop.xlane.xlu1 %153 }
 0x225   :  { %3906 = vrsqrt.f32 %v157_v19  ;;  %v156_v21 = vmul.f32 0.03125, %v154_v20  ;;  %v3733_v19 = vpack.c.bf16 %v648_v18, %v647_v17 }
 0x227   :  { %v158_v22 = vadd.f32 1e-06, %v156_v21  ;;  %3734 = vmatprep.subr.bf16.mxu0 %v3733_v19 }
 0x228   :  { %3736 = vmatpush3.bf16.msra.mxu0 %v3733_v19 }
 0x229   :  { %3908 = vrsqrt.f32 %v158_v22 }
 0x22f   :  { %v3907_v23 = vpop.eup %3906 }
 0x230   :  { %v161_v25 = vmul.f32 %v3907_v23, %v145_v2  ;;  %v913_v23 = vld [vmem:[%s4712_s1 + $0x190] sm:$0xff] }
 0x232   :  { %v167_v27 = vmul.f32 %v3139_v24, %v161_v25 }
 0x233   :  { %v3909_v28 = vpop.eup %3908 }
 0x234   :  { %v4186_v29 = vadd.f32 %v3140_v26, %v167_v27  ;;  %v162_v30 = vmul.f32 %v3909_v28, %v146_v6 }
 0x236   :  { %v168_v33 = vmul.f32 %v3139_v24, %v162_v30  ;;  %3436 = vmatprep.mubr.msk.f32.mxu1 %vm134_vm0, %v4186_v29  ;;  %v914_v24 = vld [vmem:[%s4712_s1 + $0x198] sm:$0xff]  ;;  %v826_v30 = vld [vmem:[%s4712_s1 + $0x180] sm:$0xff] }
 0x237   :  { %v3749_v28 = vpack.c.bf16 %v914_v24, %v913_v23  ;;  %v3743_v32 = vpack.c.bf16 %v827_v31, %v826_v30  ;;  %v3165_v23 = vld [vmem:[%s4712_s1 + $0x124] ss:$0 sm:$0xff] }
 0x238   :  { %v4196_v34 = vadd.f32 %v3140_v26, %v168_v33 }
 0x239   :  { %3745 = vmatprep.subr.msk.bf16.mxu0 %vm4164_vm2, %v3743_v32 }
 0x23a   :  { %3437 = vmatmul.mubr.msk.f32.vlgmr.msra.gmra.mrb[0].mxu1 %vm134_vm0, %v4196_v34 }
 0x23b   :  { %3714 = vmatpush3.bf16.xpose.msk.msra.mxu1 %vm4164_vm2, %v3709_v16  ;;  %3443 = vmatprep.mubr.msk.f32.mxu1 %vm134_vm0, %v4186_v29  ;;  %v3737_v16 = vpack.c.bf16 %v740_v15, %v739_v14 }
 0x23c   :  { %3717 = vmatprep.subr.msk.bf16.mxu1 %vm4164_vm2, %v3715_v35 }
 0x242   :  { %3444 = vmatmul.mubr.msk.f32.vlgmr.msra.gmra.mrb[2].mxu1 %vm134_vm0, %v4196_v34 }
 0x243   :  { %3720 = vmatpush3.bf16.xpose.msk.msra.mxu1 %vm4164_vm2, %v3715_v35  ;;  %3450 = vmatprep.mubr.msk.f32.mxu1 %vm134_vm0, %v4186_v29 }
 0x24a   :  { %3451 = vmatmul.mubr.msk.f32.vlgmr.msra.gmra.mrb[4].mxu1 %vm134_vm0, %v4196_v34 }
 0x30d   :  { %v3438_v37 = vpop.f32.mrb[0].mxu1 }
 0x30e   :  { %v263_v38 = vpop.f32.mrb[1].mxu1  ;;  %v269_v53 = vadd.f32 %v3438_v37, %v3141_v36 }
 0x30f   :  { %v264_v39 = vadd.f32 %v3141_v36, %v263_v38  ;;  %v3166_v36 = vld [vmem:[%s4712_s1 + $0x127] ss:$0 sm:$0xff] }
 0x311   :  { %3457 = vmatprep.mubr.msk.f32.mxu1 %vm446_vm3, %v264_v39 }
 0x315   :  { %v3445_v41 = vpop.f32.mrb[2].mxu1 }
 0x316   :  { %v356_v42 = vadd.f32 %v3445_v41, %v3146_v40  ;;  %v350_v43 = vpop.f32.mrb[3].mxu1  ;;  %v3176_v41 = vld [vmem:[%s4712_s1 + $0x12b] ss:$0 sm:$0xff] }
 0x317   :  { %v351_v44 = vadd.f32 %v3146_v40, %v350_v43 }
 0x319   :  { %v3721_v46 = vpack.c.bf16 %v356_v42, %v351_v44 }
 0x31b   :  { %3723 = vmatprep.subr.msk.bf16.mxu1 %vm4223_vm4, %v3721_v46 }
 0x31c   :  { %3726 = vmatpush3.bf16.xpose.msk.msra.mxu1 %vm4223_vm4, %v3721_v46 }
 0x31d   :  { %v3452_v48 = vpop.f32.mrb[4].mxu1 }
 0x31e   :  { %v443_v49 = vadd.f32 %v3452_v48, %v3151_v47  ;;  %v437_v50 = vpop.f32.mrb[5].mxu1 }
 0x31f   :  { %v438_v51 = vadd.f32 %v3151_v47, %v437_v50 }
 0x321   :  { %v3727_v54 = vpack.c.bf16 %v443_v49, %v438_v51 }
 0x323   :  { %3458 = vmatmul.mubr.msk.f32.vlgmr.msra.gmra.mrb[6].mxu1 %vm446_vm3, %v269_v53  ;;  %3729 = vmatprep.subr.msk.bf16.mxu1 %vm4234_vm7, %v3727_v54 }
 0x324   :  { %3732 = vmatpush3.bf16.msk.msra.mxu1 %vm4234_vm7, %v3727_v54 }
 0x325   :  { %3739 = vmatprep.subr.msk.bf16.mxu1 %vm4164_vm2, %v3737_v16 }
 0x3f6   :  { %v3459_v55 = vpop.f32.mrb[6].mxu1 }
 0x3f7   :  { %v535_v58 = vmul.f32 0.25, %v3459_v55  ;;  %v525_v59 = vpop.f32.mrb[7].mxu1 }
 0x3f8   :  { %v534_v61 = vmul.f32 0.25, %v525_v59 }
 0x3f9   :  { %v537_v63 = vadd.f32 %v535_v58, %v4246_v57 }
 0x3fa   :  { %v536_v0 = vadd.f32 %v534_v61, %v4251_v60 }
 0x3fb   :  { %v543_v1 = vsel %vm542_vm8, %v537_v63, -inf }
 0x3fc   :  { %544 = vmax.xlane.f32.xlu1 %v543_v1  ;;  %v539_v2 = vsel %vm538_vm9, %v536_v0, -inf }
 0x3fd   :  { %540 = vmax.xlane.f32.xlu0 %v539_v2 }
 0x489   :  { %v545_v3 = vpop.xlane.xlu1 %544 }
 0x48a   :  { %v547_v4 = vsub.f32 %v537_v63, %v545_v3  ;;  %v541_v5 = vpop.xlane.xlu0 %540 }
 0x48b   :  { %v546_v6 = vsub.f32 %v536_v0, %v541_v5 }
 0x48c   :  { %v550_v7 = vmul.f32 1.442695, %v547_v4 }
 0x48d   :  { %v548_v8 = vmul.f32 1.442695, %v546_v6 }
 0x48e   :  { %3910 = vpow2.f32 %v550_v7 }
 0x48f   :  { %3912 = vpow2.f32 %v548_v8 }
 0x498   :  { %v3911_v9 = vpop.eup %3910 }
 0x499   :  { %v3913_v10 = vpop.eup %3912  ;;  %v555_v11 = vsel %vm542_vm8, %v3911_v9, 0.0 }
 0x49a   :  { %556 = vadd.xlane.f32.xlu1 %v555_v11  ;;  %v552_v12 = vsel %vm538_vm9, %v3913_v10, 0.0  ;;  %v1197_v11 = vld [vmem:[%s4712_s1 + $0x1a0] sm:$0xff] }
 0x49b   :  { %553 = vadd.xlane.f32.xlu0 %v552_v12  ;;  %v1198_v12 = vld [vmem:[%s4712_s1 + $0x1a8] sm:$0xff] }
 0x49c   :  { %v3767_v14 = vpack.c.bf16 %v1198_v12, %v1197_v11  ;;  %v1471_v11 = vld [vmem:[%s4712_s1 + $0x1d8] sm:$0xff] }
 0x527   :  { %v557_v20 = vpop.xlane.xlu1 %556 }
 0x528   :  { %3914 = vrcp.f32 %v557_v20  ;;  %v554_v21 = vpop.xlane.xlu0 %553 }
 0x529   :  { %3916 = vrcp.f32 %v554_v21 }
 0x532   :  { %v3915_v22 = vpop.eup %3914 }
 0x533   :  { %v3917_v25 = vpop.eup %3916  ;;  %v561_v27 = vmul.f32 %v3915_v22, %v3911_v9 }
 0x534   :  { %v560_v26 = vmul.f32 %v3917_v25, %v3913_v10 }
 0x536   :  { %3464 = vmatprep.mubr.msk.f32.mxu1 %vm538_vm9, %v560_v26 }
 0x537   :  { %3465 = vmatmul.mubr.msk.f32.vlgmr.msra.gmra.mrb[8].mxu1 %vm538_vm9, %v561_v27 }
 0x538   :  { %3742 = vmatpush3.bf16.xpose.msk.msra.mxu1 %vm4164_vm2, %v3737_v16  ;;  %3478 = vmatprep.mubr.msk.f32.mxu1 %vm134_vm0, %v4186_v29 }
 0x539   :  { %3751 = vmatprep.subr.msk.bf16.mxu1 %vm4164_vm2, %v3749_v28 }
 0x53f   :  { %3479 = vmatmul.mubr.msk.f32.vlgmr.msra.gmra.mrb[10].mxu1 %vm134_vm0, %v4196_v34 }
 0x540   :  { %3754 = vmatpush3.bf16.xpose.msk.msra.mxu1 %vm4164_vm2, %v3749_v28  ;;  %3492 = vmatprep.mubr.msk.f32.mxu1 %vm134_vm0, %v4186_v29 }
 0x547   :  { %3493 = vmatmul.mubr.msk.f32.vlgmr.msra.gmra.mrb[12].mxu1 %vm134_vm0, %v4196_v34 }
 0x60a   :  { %v3466_v33 = vpop.f32.mrb[8].mxu1 }
 0x60b   :  { %v638_v35 = vpop.f32.mrb[9].mxu1 }
 0x60c   :  { %3471 = vmatprep.mubr.msk.f32.mxu0 %vm446_vm3, %v638_v35 }
 0x60d   :  { %3472 = vmatmul.mubr.msk.f32.vlgmr.msra.gmra.mrb[4].mxu0 %vm446_vm3, %v3466_v33 }
 0x60e   :  { %3748 = vmatpush3.bf16.xpose.msk.msra.mxu0 %vm4164_vm2, %v3743_v32  ;;  %3485 = vmatprep.mubr.msk.f32.mxu0 %vm134_vm0, %v4186_v29 }
 0x612   :  { %v3480_v37 = vpop.f32.mrb[10].mxu1 }
 0x613   :  { %v823_v38 = vadd.f32 %v3480_v37, %v3166_v36  ;;  %v817_v39 = vpop.f32.mrb[11].mxu1 }
 0x614   :  { %v818_v40 = vadd.f32 %v3166_v36, %v817_v39 }
 0x615   :  { %3486 = vmatmul.mubr.msk.f32.vlgmr.msra.gmra.mrb[6].mxu0 %vm134_vm0, %v4196_v34  ;;  %v3171_v34 = vld [vmem:[%s4712_s1 + $0x129] ss:$0 sm:$0xff] }
 0x616   :  { %3499 = vmatprep.mubr.msk.f32.mxu0 %vm446_vm3, %v818_v40 }
 0x61a   :  { %v3494_v42 = vpop.f32.mrb[12].mxu1 }
 0x61b   :  { %v997_v43 = vadd.f32 %v3494_v42, %v3176_v41  ;;  %v991_v29 = vpop.f32.mrb[13].mxu1  ;;  %v1324_v42 = vld [vmem:[%s4713_s2] sm:$0xff] }
 0x61c   :  { %v992_v44 = vadd.f32 %v3176_v41, %v991_v29 }
 0x61e   :  { %v3761_v46 = vpack.c.bf16 %v997_v43, %v992_v44  ;;  %v1325_v43 = vld [vmem:[%s4713_s2 + $0x8] sm:$0xff]  ;;  %v1326_v44 = vld [vmem:[%s4713_s2 + $0x10] sm:$0xff] }
 0x61f   :  { %v3771_v29 = vpack.c.bf16 %v1325_v43, %v1324_v42 }
 0x620   :  { %3763 = vmatprep.subr.msk.bf16.mxu1 %vm4234_vm7, %v3761_v46 }
 0x621   :  { %3766 = vmatpush3.bf16.msk.msra.mxu1 %vm4234_vm7, %v3761_v46  ;;  %v1327_v46 = vld [vmem:[%s4713_s2 + $0x18] sm:$0xff] }
 0x622   :  { %3772 = vmatprep.subr.bf16.mxu1 %v3771_v29 }
 0x6e8   :  { %v3487_v47 = vpop.f32.mrb[6].mxu0 }
 0x6e9   :  { %v910_v48 = vadd.f32 %v3487_v47, %v3171_v34  ;;  %v904_v49 = vpop.f32.mrb[7].mxu0 }
 0x6ea   :  { %v905_v50 = vadd.f32 %v3171_v34, %v904_v49  ;;  %v3775_v34 = vpack.c.bf16 %v1327_v46, %v1326_v44 }
 0x6ec   :  { %v3755_v51 = vpack.c.bf16 %v910_v48, %v905_v50 }
 0x6ee   :  { %3757 = vmatprep.subr.msk.bf16.mxu0 %vm4223_vm4, %v3755_v51 }
 0x6ef   :  { %3760 = vmatpush3.bf16.xpose.msk.msra.mxu0 %vm4223_vm4, %v3755_v51 }
 0x6f0   :  { %3768 = vmatprep.subr.bf16.mxu0 %v3767_v14 }
 0x6f6   :  { %3500 = vmatmul.mubr.msk.f32.vlgmr.msra.gmra.mrb[8].mxu0 %vm446_vm3, %v823_v38 }
 0x6f7   :  { %3770 = vmatpush3.bf16.msra.mxu0 %v3767_v14  ;;  %v1472_v14 = vld [vmem:[%s4712_s1 + $0x1e0] sm:$0xff] }
 0x7c9   :  { %v3501_v53 = vpop.f32.mrb[8].mxu0 }
 0x7ca   :  { %v1088_v54 = vmul.f32 0.25, %v3501_v53  ;;  %v1078_v55 = vpop.f32.mrb[9].mxu0 }
 0x7cb   :  { %v1087_v58 = vmul.f32 0.25, %v1078_v55  ;;  %v3190_v55 = vld [vmem:[%s4712_s1 + $0x122] ss:$0 sm:$0xff] }
 0x7cc   :  { %v1090_v59 = vadd.f32 %v1088_v54, %v4246_v57 }
 0x7cd   :  { %v1089_v61 = vadd.f32 %v1087_v58, %v4251_v60 }
 0x7ce   :  { %v1094_v63 = vsel %vm542_vm8, %v1090_v59, -inf }
 0x7cf   :  { %1095 = vmax.xlane.f32.xlu1 %v1094_v63  ;;  %v1091_v0 = vsel %vm538_vm9, %v1089_v61, -inf  ;;  %v3191_v63 = vld [vmem:[%s4712_s1 + $0x123] ss:$0 sm:$0xff] }
 0x7d0   :  { %1092 = vmax.xlane.f32.xlu0 %v1091_v0 }
 0x85c   :  { %v1096_v1 = vpop.xlane.xlu1 %1095 }
 0x85d   :  { %v1098_v2 = vsub.f32 %v1090_v59, %v1096_v1  ;;  %v1093_v3 = vpop.xlane.xlu0 %1092 }
 0x85e   :  { %v1097_v4 = vsub.f32 %v1089_v61, %v1093_v3 }
 0x85f   :  { %v1101_v5 = vmul.f32 1.442695, %v1098_v2 }
 0x860   :  { %v1099_v6 = vmul.f32 1.442695, %v1097_v4  ;;  %v1466_v4 = vld [vmem:[%s4712_s1 + $0x1b0] sm:$0xff] }
 0x861   :  { %3918 = vpow2.f32 %v1101_v5  ;;  %v1467_v5 = vld [vmem:[%s4712_s1 + $0x1b8] sm:$0xff] }
 0x862   :  { %3920 = vpow2.f32 %v1099_v6  ;;  %v3779_v6 = vpack.c.bf16 %v1467_v5, %v1466_v4 }
 0x864   :  { %3780 = vmatprep.subr.bf16.mxu0 %v3779_v6 }
 0x86b   :  { %v3919_v7 = vpop.eup %3918 }
 0x86c   :  { %v3921_v8 = vpop.eup %3920  ;;  %v1106_v9 = vsel %vm542_vm8, %v3919_v7, 0.0 }
 0x86d   :  { %1107 = vadd.xlane.f32.xlu1 %v1106_v9  ;;  %v1103_v10 = vsel %vm538_vm9, %v3921_v8, 0.0 }
 0x86e   :  { %1104 = vadd.xlane.f32.xlu0 %v1103_v10  ;;  %v1470_v10 = vld [vmem:[%s4712_s1 + $0x1d0] sm:$0xff] }
 0x86f   :  { %v3787_v12 = vpack.c.bf16 %v1471_v11, %v1470_v10 }
 0x8fa   :  { %v1108_v15 = vpop.xlane.xlu1 %1107 }
 0x8fb   :  { %3922 = vrcp.f32 %v1108_v15  ;;  %v1105_v16 = vpop.xlane.xlu0 %1104  ;;  %v1473_v15 = vld [vmem:[%s4712_s1 + $0x1e8] sm:$0xff] }
 0x8fc   :  { %3924 = vrcp.f32 %v1105_v16  ;;  %v3791_v16 = vpack.c.bf16 %v1473_v15, %v1472_v14 }
 0x905   :  { %v3923_v17 = vpop.eup %3922 }
 0x906   :  { %v3925_v18 = vpop.eup %3924  ;;  %v1112_v20 = vmul.f32 %v3923_v17, %v3919_v7  ;;  %v1468_v7 = vld [vmem:[%s4712_s1 + $0x1c0] sm:$0xff] }
 0x907   :  { %v1111_v19 = vmul.f32 %v3925_v18, %v3921_v8  ;;  %v1469_v8 = vld [vmem:[%s4712_s1 + $0x1c8] sm:$0xff]  ;;  %v3192_v17 = vld [vmem:[%s4713_s2 + $0x20] ss:$0 sm:$0xff] }
 0x908   :  { %v3783_v9 = vpack.c.bf16 %v1469_v8, %v1468_v7 }
 0x909   :  { %3506 = vmatprep.mubr.msk.f32.mxu1 %vm538_vm9, %v1111_v19 }
 0x90a   :  { %3507 = vmatmul.mubr.msk.f32.vlgmr.msra.gmra.mrb[14].mxu1 %vm538_vm9, %v1112_v20 }
 0x90b   :  { %3774 = vmatpush3.bf16.msra.mxu1 %v3771_v29 }
 0x90c   :  { %3776 = vmatprep.subr.bf16.mxu1 %v3775_v34 }
 0x90f   :  { %3778 = vmatpush3.bf16.msra.mxu1 %v3775_v34 }
 0x9dd   :  { %v3508_v21 = vpop.f32.mrb[14].mxu1 }
 0x9de   :  { %v1188_v22 = vpop.f32.mrb[15].mxu1 }
 0x9df   :  { %3513 = vmatprep.mubr.msk.f32.mxu0 %vm446_vm3, %v1188_v22 }
 0x9e0   :  { %3514 = vmatmul.mubr.msk.f32.vlgmr.msra.gmra.mrb[4].mxu0 %vm446_vm3, %v3508_v21 }
 0x9e1   :  { %3782 = vmatpush3.bf16.msra.mxu0 %v3779_v6 }
 0x9e2   :  { %3784 = vmatprep.subr.bf16.mxu0 %v3783_v9 }
 0x9e5   :  { %3786 = vmatpush3.bf16.msra.mxu0 %v3783_v9 }
 0x9e6   :  { %3788 = vmatprep.subr.bf16.mxu0 %v3787_v12 }
 0x9e9   :  { %3790 = vmatpush3.bf16.msra.mxu0 %v3787_v12 }
 0x9ea   :  { %3792 = vmatprep.subr.bf16.mxu0 %v3791_v16 }
 0x9ed   :  { %3794 = vmatpush3.bf16.msra.mxu0 %v3791_v16  ;;  %v3197_v16 = vld [vmem:[%s4712_s1 + $0x125] ss:$0 sm:$0xff] }
 0xab3   :  { %v3515_v24 = vpop.f32.mrb[4].mxu0 }
 0xab4   :  { %v3893_v25 = vadd.f32 %v3515_v24, %v3165_v23  ;;  %v1271_v26 = vpop.f32.mrb[5].mxu0 }
 0xab5   :  { %v3894_v27 = vadd.f32 %v3165_v23, %v1271_v26 }
 0xab6   :  { %v4350_v28 = vadd.f32 %v3893_v25, %v4148_v62 }
 0xab7   :  { %v4353_v30 = vadd.f32 %v3894_v27, %v4141_v56 }
 0xab8   :  { %v1289_v31 = vsel %vm138_vm1, %v4350_v28, 0.0 }
 0xab9   :  { %1290 = vadd.xlane.f32.xlu1 %v1289_v31  ;;  %v1286_v32 = vsel %vm134_vm0, %v4353_v30, 0.0 }
 0xaba   :  { %1287 = vadd.xlane.f32.xlu0 %v1286_v32 }
 0xb46   :  { %v1291_v33 = vpop.xlane.xlu1 %1290 }
 0xb47   :  { %v1293_v35 = vmul.f32 0.03125, %v1291_v33  ;;  %v1288_v36 = vpop.xlane.xlu0 %1287 }
 0xb48   :  { %v1292_v37 = vmul.f32 0.03125, %v1288_v36 }
 0xb49   :  { %v1295_v38 = vsub.f32 %v4350_v28, %v1293_v35 }
 0xb4a   :  { %v1294_v62 = vsub.f32 %v4353_v30, %v1292_v37 }
 0xb4b   :  { %v1297_v39 = vmul.f32 %v1295_v38, %v1295_v38 }
 0xb4c   :  { %v1296_v40 = vmul.f32 %v1294_v62, %v1294_v62 }
 0xb4d   :  { %v1301_v56 = vsel %vm138_vm1, %v1297_v39, 0.0 }
 0xb4e   :  { %1302 = vadd.xlane.f32.xlu1 %v1301_v56  ;;  %v1298_v41 = vsel %vm134_vm0, %v1296_v40, 0.0 }
 0xb4f   :  { %1299 = vadd.xlane.f32.xlu0 %v1298_v41 }
 0xbdb   :  { %v1303_v47 = vpop.xlane.xlu1 %1302 }
 0xbdc   :  { %v1305_v48 = vmul.f32 0.03125, %v1303_v47  ;;  %v1300_v49 = vpop.xlane.xlu0 %1299 }
 0xbdd   :  { %v1304_v50 = vmul.f32 0.03125, %v1300_v49 }
 0xbde   :  { %v1307_v51 = vadd.f32 1e-06, %v1305_v48 }
 0xbdf   :  { %v1306_v53 = vadd.f32 1e-06, %v1304_v50 }
 0xbe0   :  { %3926 = vrsqrt.f32 %v1307_v51 }
 0xbe1   :  { %3928 = vrsqrt.f32 %v1306_v53 }
 0xbea   :  { %v3927_v54 = vpop.eup %3926 }
 0xbeb   :  { %v3929_v58 = vpop.eup %3928  ;;  %v1311_v59 = vmul.f32 %v3927_v54, %v1295_v38 }
 0xbec   :  { %v1310_v61 = vmul.f32 %v3929_v58, %v1294_v62 }
 0xbed   :  { %v1317_v0 = vmul.f32 %v3190_v55, %v1311_v59 }
 0xbee   :  { %v1316_v1 = vmul.f32 %v3190_v55, %v1310_v61 }
 0xbef   :  { %v1323_v3 = vadd.f32 %v3191_v63, %v1317_v0 }
 0xbf0   :  { %v1322_v2 = vadd.f32 %v3191_v63, %v1316_v1 }
 0xbf2   :  { %3524 = vmatprep.mubr.msk.f32.mxu1 %vm134_vm0, %v1322_v2 }
 0xbf3   :  { %3525 = vmatmul.mubr.msk.f32.vlgmr.msra.gmra.mrb[16].mxu1 %vm134_vm0, %v1323_v3 }
 0xcc6   :  { %v3526_v18 = vpop.f32.mrb[16].mxu1 }
 0xcc7   :  { %v1411_v19 = vadd.f32 %v3526_v18, %v3192_v17  ;;  %v1405_v20 = vpop.f32.mrb[17].mxu1 }
 0xcc8   :  { %v1406_v21 = vadd.f32 %v3192_v17, %v1405_v20 }
 0xcc9   :  { %v1417_v22 = vmul.f32 0.70710677, %v1411_v19  ;;  %v1415_v11 = vmul.f32 0.5, %v1411_v19 }
 0xcca   :  { %v1416_v23 = vmul.f32 0.70710677, %v1406_v21  ;;  %v1414_v9 = vmul.f32 0.5, %v1406_v21 }
 0xccb   :  { %v1419_v24 = vand.u32 2147483647, %v1417_v22  ;;  %v1445_v33 = vsub.f32 0.0, %v1417_v22  ;;  %vm1457_vm10 = vcmp.ge.f32.partialorder %v1417_v22, 0.0 }
 0xccc   :  { %v1418_v25 = vand.u32 2147483647, %v1416_v23  ;;  %v1444_v35 = vsub.f32 0.0, %v1416_v23  ;;  %vm1456_vm11 = vcmp.ge.f32.partialorder %v1416_v23, 0.0 }
 0xccd   :  { %v1421_v26 = vmul.f32 0.3275911, %v1419_v24  ;;  %v1447_v37 = vmul.f32 %v1445_v33, %v1417_v22 }
 0xcce   :  { %v1420_v27 = vmul.f32 0.3275911, %v1418_v25  ;;  %v1446_v39 = vmul.f32 %v1444_v35, %v1416_v23 }
 0xccf   :  { %v1423_v31 = vadd.f32 1.0, %v1421_v26  ;;  %v1450_v41 = vmul.f32 1.442695, %v1447_v37  ;;  %v1610_v37 = vld [vmem:[%s4712_s1 + $0x208] sm:$0xff] }
 0xcd0   :  { %v1422_v32 = vadd.f32 1.0, %v1420_v27  ;;  %v1448_v29 = vmul.f32 1.442695, %v1446_v39  ;;  %v1790_v39 = vld [vmem:[%s4712_s1 + $0x228] sm:$0xff] }
 0xcd1   :  { %3930 = vrcp.f32 %v1423_v31 }
 0xcd2   :  { %3932 = vrcp.f32 %v1422_v32 }
 0xcd3   :  { %3934 = vpow2.f32 %v1450_v41  ;;  %v1703_v41 = vld [vmem:[%s4712_s1 + $0x218] sm:$0xff] }
 0xcd4   :  { %3936 = vpow2.f32 %v1448_v29 }
 0xcdb   :  { %v3931_v36 = vpop.eup %3930 }
 0xcdc   :  { %v1427_v38 = vmul.f32 1.0614054, %v3931_v36  ;;  %v3933_v62 = vpop.eup %3932 }
 0xcdd   :  { %v1426_v56 = vmul.f32 1.0614054, %v3933_v62  ;;  %v3935_v59 = vpop.eup %3934 }
 0xcde   :  { %v1429_v40 = vadd.f32 -1.4531521, %v1427_v38  ;;  %v3937_v0 = vpop.eup %3936 }
 0xcdf   :  { %v1428_v43 = vadd.f32 -1.4531521, %v1426_v56  ;;  %v1702_v56 = vld [vmem:[%s4712_s1 + $0x210] sm:$0xff] }
 0xce0   :  { %v1431_v42 = vmul.f32 %v3931_v36, %v1429_v40 }
 0xce1   :  { %v1430_v46 = vmul.f32 %v3933_v62, %v1428_v43 }
 0xce2   :  { %v1433_v44 = vadd.f32 1.4214138, %v1431_v42  ;;  %v3801_v42 = vpack.c.bf16 %v1703_v41, %v1702_v56 }
 0xce3   :  { %v1432_v47 = vadd.f32 1.4214138, %v1430_v46 }
 0xce4   :  { %v1435_v34 = vmul.f32 %v3931_v36, %v1433_v44 }
 0xce5   :  { %v1434_v49 = vmul.f32 %v3933_v62, %v1432_v47 }
 0xce6   :  { %v1437_v48 = vadd.f32 -0.28449672, %v1435_v34 }
 0xce7   :  { %v1436_v51 = vadd.f32 -0.28449672, %v1434_v49  ;;  %v3198_v49 = vld [vmem:[%s4712_s1 + $0x1f0] ss:$0 sm:$0xff] }
 0xce8   :  { %v1439_v50 = vmul.f32 %v3931_v36, %v1437_v48 }
 0xce9   :  { %v1438_v54 = vmul.f32 %v3933_v62, %v1436_v51 }
 0xcea   :  { %v1441_v53 = vadd.f32 0.2548296, %v1439_v50 }
 0xceb   :  { %v1440_v58 = vadd.f32 0.2548296, %v1438_v54  ;;  %v3199_v54 = vld [vmem:[%s4712_s1 + $0x1f1] ss:$0 sm:$0xff] }
 0xcec   :  { %v1443_v55 = vmul.f32 %v3931_v36, %v1441_v53  ;;  %v1609_v36 = vld [vmem:[%s4712_s1 + $0x200] sm:$0xff] }
 0xced   :  { %v1442_v63 = vmul.f32 %v3933_v62, %v1440_v58  ;;  %v3795_v38 = vpack.c.bf16 %v1610_v37, %v1609_v36  ;;  %v1789_v62 = vld [vmem:[%s4712_s1 + $0x220] sm:$0xff] }
 0xcee   :  { %v1453_v61 = vmul.f32 %v3935_v59, %v1443_v55  ;;  %v3807_v40 = vpack.c.bf16 %v1790_v39, %v1789_v62  ;;  %v3235_v62 = vld [vmem:[%s4712_s1 + $0x1fb] ss:$0 sm:$0xff] }
 0xcef   :  { %v1452_v2 = vmul.f32 %v3937_v0, %v1442_v63  ;;  %3797 = vmatprep.subr.msk.bf16.mxu1 %vm4164_vm2, %v3795_v38  ;;  %v3210_v63 = vld [vmem:[%s4712_s1 + $0x1fa] ss:$0 sm:$0xff]  ;;  %v3200_v0 = vld [vmem:[%s4712_s1 + $0x1f6] ss:$0 sm:$0xff] }
 0xcf0   :  { %v1455_v1 = vsub.f32 1.0, %v1453_v61  ;;  %3800 = vmatpush3.bf16.xpose.msk.msra.mxu1 %vm4164_vm2, %v3795_v38  ;;  %3809 = vmatprep.subr.msk.bf16.mxu0 %vm4164_vm2, %v3807_v40 }
 0xcf1   :  { %v1454_v4 = vsub.f32 1.0, %v1452_v2  ;;  %3803 = vmatprep.subr.msk.bf16.mxu1 %vm4164_vm2, %v3801_v42 }
 0xcf2   :  { %v1459_v3 = vsub.f32 0.0, %v1455_v1 }
 0xcf3   :  { %v1458_v6 = vsub.f32 0.0, %v1454_v4 }
 0xcf4   :  { %v1461_v5 = vsel %vm1457_vm10, %v1455_v1, %v1459_v3 }
 0xcf5   :  { %v1463_v7 = vadd.f32 1.0, %v1461_v5  ;;  %v1460_v8 = vsel %vm1456_vm11, %v1454_v4, %v1458_v6 }
 0xcf6   :  { %v1462_v10 = vadd.f32 1.0, %v1460_v8 }
 0xcf7   :  { %v1465_v14 = vmul.f32 %v1463_v7, %v1415_v11 }
 0xcf8   :  { %v1464_v12 = vmul.f32 %v1462_v10, %v1414_v9  ;;  %v3205_v9 = vld [vmem:[%s4712_s1 + $0x1f8] ss:$0 sm:$0xff] }
 0xcfa   :  { %3543 = vmatprep.mubr.msk.f32.mxu0 %vm1474_vm12, %v1464_v12 }
 0xcfb   :  { %3544 = vmatmul.mubr.msk.f32.vlgmr.msra.gmra.mrb[10].mxu0 %vm1474_vm12, %v1465_v14  ;;  %v2165_v14 = vld [vmem:[%s4712_s1 + $0x240] sm:$0xff] }
 0xcfc   :  { %3812 = vmatpush3.bf16.xpose.msk.msra.mxu0 %vm4164_vm2, %v3807_v40 }
 0xdce   :  { %v3545_v15 = vpop.f32.mrb[10].mxu0 }
 0xdcf   :  { %v1557_v17 = vadd.f32 %v3545_v15, %v4350_v28  ;;  %v1547_v18 = vpop.f32.mrb[11].mxu0  ;;  %v2166_v15 = vld [vmem:[%s4712_s1 + $0x248] sm:$0xff] }
 0xdd0   :  { %v1556_v20 = vadd.f32 %v1547_v18, %v4353_v30  ;;  %v3829_v18 = vpack.c.bf16 %v2166_v15, %v2165_v14 }
 0xdd1   :  { %v4417_v21 = vadd.f32 %v3197_v16, %v1557_v17 }
 0xdd2   :  { %v4419_v19 = vadd.f32 %v3197_v16, %v1556_v20  ;;  %v2339_v20 = vld [vmem:[%s4712_s1 + $0x260] sm:$0xff] }
 0xdd3   :  { %v1570_v22 = vsel %vm138_vm1, %v4417_v21, 0.0 }
 0xdd4   :  { %1571 = vadd.xlane.f32.xlu1 %v1570_v22  ;;  %v1567_v23 = vsel %vm134_vm0, %v4419_v19, 0.0  ;;  %v2340_v22 = vld [vmem:[%s4712_s1 + $0x268] sm:$0xff] }
 0xdd5   :  { %1568 = vadd.xlane.f32.xlu0 %v1567_v23 }
 0xe61   :  { %v1572_v24 = vpop.xlane.xlu1 %1571 }
 0xe62   :  { %v1574_v25 = vmul.f32 0.03125, %v1572_v24  ;;  %v1569_v26 = vpop.xlane.xlu0 %1568  ;;  %v3841_v24 = vpack.c.bf16 %v2340_v22, %v2339_v20 }
 0xe63   :  { %v1573_v27 = vmul.f32 0.03125, %v1569_v26 }
 0xe64   :  { %v1576_v28 = vsub.f32 %v4417_v21, %v1574_v25 }
 0xe65   :  { %v1575_v30 = vsub.f32 %v4419_v19, %v1573_v27 }
 0xe66   :  { %v1578_v31 = vmul.f32 %v1576_v28, %v1576_v28 }
 0xe67   :  { %v1577_v32 = vmul.f32 %v1575_v30, %v1575_v30 }
 0xe68   :  { %v1582_v33 = vsel %vm138_vm1, %v1578_v31, 0.0 }
 0xe69   :  { %1583 = vadd.xlane.f32.xlu1 %v1582_v33  ;;  %v1579_v35 = vsel %vm134_vm0, %v1577_v32, 0.0 }
 0xe6a   :  { %1580 = vadd.xlane.f32.xlu0 %v1579_v35  ;;  %v3225_v35 = vld [vmem:[%s4712_s1 + $0x1f7] ss:$0 sm:$0xff] }
 0xef6   :  { %v1584_v43 = vpop.xlane.xlu1 %1583 }
 0xef7   :  { %v1586_v29 = vmul.f32 0.03125, %v1584_v43  ;;  %v1581_v44 = vpop.xlane.xlu0 %1580 }
 0xef8   :  { %v1585_v46 = vmul.f32 0.03125, %v1581_v44 }
 0xef9   :  { %v1588_v34 = vadd.f32 1e-06, %v1586_v29 }
 0xefa   :  { %v1587_v47 = vadd.f32 1e-06, %v1585_v46 }
 0xefb   :  { %3938 = vrsqrt.f32 %v1588_v34 }
 0xefc   :  { %3940 = vrsqrt.f32 %v1587_v47 }
 0xf05   :  { %v3939_v48 = vpop.eup %3938 }
 0xf06   :  { %v3941_v50 = vpop.eup %3940  ;;  %v1592_v51 = vmul.f32 %v3939_v48, %v1576_v28 }
 0xf07   :  { %v1591_v53 = vmul.f32 %v3941_v50, %v1575_v30 }
 0xf08   :  { %v1598_v55 = vmul.f32 %v3198_v49, %v1592_v51 }
 0xf09   :  { %v1597_v58 = vmul.f32 %v3198_v49, %v1591_v53  ;;  %v2074_v53 = vld [vmem:[%s4712_s1 + $0x238] sm:$0xff] }
 0xf0a   :  { %v4465_v61 = vadd.f32 %v3199_v54, %v1598_v55 }
 0xf0b   :  { %v4463_v59 = vadd.f32 %v3199_v54, %v1597_v58  ;;  %v3825_v54 = vpack.c.bf16 %v2074_v53, %v2073_v52 }
 0xf0d   :  { %3550 = vmatprep.mubr.msk.f32.mxu1 %vm134_vm0, %v4463_v59  ;;  %3564 = vmatprep.mubr.msk.f32.mxu0 %vm134_vm0, %v4463_v59 }
 0xf0e   :  { %3551 = vmatmul.mubr.msk.f32.vlgmr.msra.gmra.mrb[18].mxu1 %vm134_vm0, %v4465_v61  ;;  %3565 = vmatmul.mubr.msk.f32.vlgmr.msra.gmra.mrb[12].mxu0 %vm134_vm0, %v4465_v61 }
 0xf0f   :  { %3806 = vmatpush3.bf16.xpose.msk.msra.mxu1 %vm4164_vm2, %v3801_v42  ;;  %3557 = vmatprep.mubr.msk.f32.mxu1 %vm134_vm0, %v4463_v59 }
 0xf16   :  { %3558 = vmatmul.mubr.msk.f32.vlgmr.msra.gmra.mrb[20].mxu1 %vm134_vm0, %v4465_v61 }
 0xfe1   :  { %v3552_v1 = vpop.f32.mrb[18].mxu1  ;;  %v3566_v2 = vpop.f32.mrb[12].mxu0 }
 0xfe2   :  { %v1873_v3 = vadd.f32 %v3566_v2, %v3210_v63  ;;  %v1693_v4 = vpop.f32.mrb[19].mxu1  ;;  %v1867_v5 = vpop.f32.mrb[13].mxu0  ;;  %v1699_v23 = vadd.f32 %v3552_v1, %v3200_v0 }
 0xfe3   :  { %v1694_v6 = vadd.f32 %v3200_v0, %v1693_v4  ;;  %v1868_v7 = vadd.f32 %v3210_v63, %v1867_v5  ;;  %v2253_v4 = vld [vmem:[%s4712_s1 + $0x258] sm:$0xff] }
 0xfe5   :  { %v3819_v8 = vpack.c.bf16 %v1873_v3, %v1868_v7  ;;  %3571 = vmatprep.mubr.msk.f32.mxu1 %vm446_vm3, %v1694_v6  ;;  %v2252_v3 = vld [vmem:[%s4712_s1 + $0x250] sm:$0xff] }
 0xfe6   :  { %v3835_v5 = vpack.c.bf16 %v2253_v4, %v2252_v3  ;;  %v2753_v3 = vld [vmem:[%s4713_s2 + $0x40] sm:$0xff] }
 0xfe7   :  { %3821 = vmatprep.subr.msk.bf16.mxu0 %vm4234_vm7, %v3819_v8 }
 0xfe8   :  { %3824 = vmatpush3.bf16.msk.msra.mxu0 %vm4234_vm7, %v3819_v8 }
 0xfe9   :  { %v3559_v10 = vpop.f32.mrb[20].mxu1  ;;  %3826 = vmatprep.subr.bf16.mxu0 %v3825_v54 }
 0xfea   :  { %v1786_v11 = vadd.f32 %v3559_v10, %v3205_v9  ;;  %v1780_v12 = vpop.f32.mrb[21].mxu1 }
 0xfeb   :  { %v1781_v16 = vadd.f32 %v3205_v9, %v1780_v12  ;;  %v3230_v9 = vld [vmem:[%s4712_s1 + $0x1f9] ss:$0 sm:$0xff] }
 0xfed   :  { %v3813_v17 = vpack.c.bf16 %v1786_v11, %v1781_v16 }
 0xfef   :  { %3815 = vmatprep.subr.msk.bf16.mxu1 %vm4223_vm4, %v3813_v17 }
 0xff0   :  { %3818 = vmatpush3.bf16.xpose.msk.msra.mxu1 %vm4223_vm4, %v3813_v17 }
 0xff1   :  { %3831 = vmatprep.subr.msk.bf16.mxu1 %vm4164_vm2, %v3829_v18 }
 0xff7   :  { %3572 = vmatmul.mubr.msk.f32.vlgmr.msra.gmra.mrb[22].mxu1 %vm446_vm3, %v1699_v23 }
 0xff8   :  { %3834 = vmatpush3.bf16.xpose.msk.msra.mxu1 %vm4164_vm2, %v3829_v18  ;;  %3592 = vmatprep.mubr.msk.f32.mxu1 %vm134_vm0, %v4463_v59 }
 0xff9   :  { %3843 = vmatprep.subr.msk.bf16.mxu1 %vm4164_vm2, %v3841_v24 }
 0xfff   :  { %3593 = vmatmul.mubr.msk.f32.vlgmr.msra.gmra.mrb[24].mxu1 %vm134_vm0, %v4465_v61 }
0x1000   :  { %3846 = vmatpush3.bf16.xpose.msk.msra.mxu1 %vm4164_vm2, %v3841_v24  ;;  %3606 = vmatprep.mubr.msk.f32.mxu1 %vm134_vm0, %v4463_v59 }
0x1007   :  { %3607 = vmatmul.mubr.msk.f32.vlgmr.msra.gmra.mrb[26].mxu1 %vm134_vm0, %v4465_v61 }
0x10ca   :  { %v3573_v25 = vpop.f32.mrb[22].mxu1 }
0x10cb   :  { %v1964_v26 = vmul.f32 0.25, %v3573_v25  ;;  %v1954_v27 = vpop.f32.mrb[23].mxu1 }
0x10cc   :  { %v1963_v28 = vmul.f32 0.25, %v1954_v27 }
0x10cd   :  { %v1966_v30 = vadd.f32 %v1964_v26, %v4246_v57 }
0x10ce   :  { %v1965_v31 = vadd.f32 %v1963_v28, %v4251_v60 }
0x10cf   :  { %v1970_v32 = vsel %vm542_vm8, %v1966_v30, -inf }
0x10d0   :  { %1971 = vmax.xlane.f32.xlu1 %v1970_v32  ;;  %v1967_v33 = vsel %vm538_vm9, %v1965_v31, -inf  ;;  %v2624_v32 = vld [vmem:[%s4712_s1 + $0x278] sm:$0xff] }
0x10d1   :  { %1968 = vmax.xlane.f32.xlu0 %v1967_v33 }
0x10d2   :  { %v3594_v36 = vpop.f32.mrb[24].mxu1 }
0x10d3   :  { %v2249_v37 = vadd.f32 %v3594_v36, %v3225_v35  ;;  %v2243_v38 = vpop.f32.mrb[25].mxu1 }
0x10d4   :  { %v2244_v8 = vadd.f32 %v3225_v35, %v2243_v38 }
0x10da   :  { %v3608_v39 = vpop.f32.mrb[26].mxu1 }
0x10db   :  { %v2423_v40 = vadd.f32 %v3608_v39, %v3235_v62  ;;  %v2417_v56 = vpop.f32.mrb[27].mxu1 }
0x10dc   :  { %v2418_v41 = vadd.f32 %v3235_v62, %v2417_v56 }
0x10de   :  { %v3853_v42 = vpack.c.bf16 %v2423_v40, %v2418_v41  ;;  %v3224_v41 = vld [vmem:[%s4712_s1 + $0x1f4] ss:$0 sm:$0xff] }
0x10e0   :  { %3855 = vmatprep.subr.msk.bf16.mxu1 %vm4234_vm7, %v3853_v42 }
0x10e1   :  { %3858 = vmatpush3.bf16.msk.msra.mxu1 %vm4234_vm7, %v3853_v42 }
0x115d   :  { %v1972_v43 = vpop.xlane.xlu1 %1971 }
0x115e   :  { %v1974_v29 = vsub.f32 %v1966_v30, %v1972_v43  ;;  %v1969_v44 = vpop.xlane.xlu0 %1968 }
0x115f   :  { %v1973_v46 = vsub.f32 %v1965_v31, %v1969_v44  ;;  %v2623_v31 = vld [vmem:[%s4712_s1 + $0x270] sm:$0xff] }
0x1160   :  { %v1977_v34 = vmul.f32 1.442695, %v1974_v29  ;;  %v3859_v33 = vpack.c.bf16 %v2624_v32, %v2623_v31  ;;  %v3251_v31 = vld [vmem:[%s4713_s2 + $0x48] ss:$0 sm:$0xff] }
0x1161   :  { %v1975_v47 = vmul.f32 1.442695, %v1973_v46 }
0x1162   :  { %3942 = vpow2.f32 %v1977_v34 }
0x1163   :  { %3944 = vpow2.f32 %v1975_v47 }
0x116c   :  { %v3943_v48 = vpop.eup %3942 }
0x116d   :  { %v3945_v49 = vpop.eup %3944  ;;  %v1982_v50 = vsel %vm542_vm8, %v3943_v48, 0.0 }
0x116e   :  { %1983 = vadd.xlane.f32.xlu1 %v1982_v50  ;;  %v1979_v51 = vsel %vm538_vm9, %v3945_v49, 0.0 }
0x116f   :  { %1980 = vadd.xlane.f32.xlu0 %v1979_v51 }
0x11fb   :  { %v1984_v55 = vpop.xlane.xlu1 %1983 }
0x11fc   :  { %3946 = vrcp.f32 %v1984_v55  ;;  %v1981_v58 = vpop.xlane.xlu0 %1980 }
0x11fd   :  { %3948 = vrcp.f32 %v1981_v58 }
0x1206   :  { %v3947_v63 = vpop.eup %3946 }
0x1207   :  { %v3949_v0 = vpop.eup %3948  ;;  %v1988_v2 = vmul.f32 %v3947_v63, %v3943_v48  ;;  %v2750_v63 = vld [vmem:[%s4713_s2 + $0x28] sm:$0xff] }
0x1208   :  { %v1987_v1 = vmul.f32 %v3949_v0, %v3945_v49  ;;  %v2751_v0 = vld [vmem:[%s4713_s2 + $0x30] sm:$0xff] }
0x120a   :  { %3578 = vmatprep.mubr.msk.f32.mxu0 %vm538_vm9, %v1987_v1  ;;  %v3863_v1 = vpack.c.bf16 %v2751_v0, %v2750_v63 }
0x120b   :  { %3579 = vmatmul.mubr.msk.f32.vlgmr.msra.gmra.mrb[14].mxu0 %vm538_vm9, %v1988_v2  ;;  %v2752_v2 = vld [vmem:[%s4713_s2 + $0x38] sm:$0xff] }
0x120c   :  { %3828 = vmatpush3.bf16.msra.mxu0 %v3825_v54  ;;  %3864 = vmatprep.subr.bf16.mxu1 %v3863_v1  ;;  %v3867_v4 = vpack.c.bf16 %v2753_v3, %v2752_v2 }
0x120d   :  { %3837 = vmatprep.subr.msk.bf16.mxu0 %vm4164_vm2, %v3835_v5 }
0x12de   :  { %v3580_v6 = vpop.f32.mrb[14].mxu0 }
0x12df   :  { %v2064_v7 = vpop.f32.mrb[15].mxu0 }
0x12e0   :  { %3585 = vmatprep.mubr.msk.f32.mxu0 %vm446_vm3, %v2064_v7 }
0x12e1   :  { %3586 = vmatmul.mubr.msk.f32.vlgmr.msra.gmra.mrb[16].mxu0 %vm446_vm3, %v3580_v6 }
0x12e2   :  { %3840 = vmatpush3.bf16.xpose.msk.msra.mxu0 %vm4164_vm2, %v3835_v5  ;;  %3599 = vmatprep.mubr.msk.f32.mxu0 %vm134_vm0, %v4463_v59  ;;  %vm3035_vm2 = vcmask 1040384  }
0x12e9   :  { %3600 = vmatmul.mubr.msk.f32.vlgmr.msra.gmra.mrb[18].mxu0 %vm134_vm0, %v4465_v61 }
0x12ea   :  { %3613 = vmatprep.mubr.msk.f32.mxu0 %vm446_vm3, %v2244_v8 }
0x13bc   :  { %v3601_v10 = vpop.f32.mrb[18].mxu0 }
0x13bd   :  { %v2336_v11 = vadd.f32 %v3601_v10, %v3230_v9  ;;  %v2330_v12 = vpop.f32.mrb[19].mxu0 }
0x13be   :  { %v2331_v14 = vadd.f32 %v3230_v9, %v2330_v12  ;;  %v3249_v12 = vld [vmem:[%s4712_s1 + $0x1f2] ss:$0 sm:$0xff] }
0x13c0   :  { %v3847_v15 = vpack.c.bf16 %v2336_v11, %v2331_v14 }
0x13c2   :  { %3849 = vmatprep.subr.msk.bf16.mxu0 %vm4223_vm4, %v3847_v15 }
0x13c3   :  { %3852 = vmatpush3.bf16.xpose.msk.msra.mxu0 %vm4223_vm4, %v3847_v15 }
0x13c4   :  { %3860 = vmatprep.subr.bf16.mxu0 %v3859_v33 }
0x13ca   :  { %3614 = vmatmul.mubr.msk.f32.vlgmr.msra.gmra.mrb[20].mxu0 %vm446_vm3, %v2249_v37 }
0x13cb   :  { %3862 = vmatpush3.bf16.msra.mxu0 %v3859_v33 }
0x149d   :  { %v3615_v13 = vpop.f32.mrb[20].mxu0 }
0x149e   :  { %v2514_v59 = vmul.f32 0.25, %v3615_v13  ;;  %v2504_v61 = vpop.f32.mrb[21].mxu0 }
0x149f   :  { %v2513_v16 = vmul.f32 0.25, %v2504_v61 }
0x14a0   :  { %v2516_v17 = vadd.f32 %v2514_v59, %v4246_v57  ;;  %v3250_v59 = vld [vmem:[%s4712_s1 + $0x1f3] ss:$0 sm:$0xff] }
0x14a1   :  { %v2515_v18 = vadd.f32 %v2513_v16, %v4251_v60 }
0x14a2   :  { %v2520_v20 = vsel %vm542_vm8, %v2516_v17, -inf }
0x14a3   :  { %2521 = vmax.xlane.f32.xlu1 %v2520_v20  ;;  %v2517_v22 = vsel %vm538_vm9, %v2515_v18, -inf  ;;  %v2892_v20 = vld [vmem:[%s4712_s1 + $0x280] sm:$0xff] }
0x14a4   :  { %2518 = vmax.xlane.f32.xlu0 %v2517_v22  ;;  %v2893_v22 = vld [vmem:[%s4712_s1 + $0x288] sm:$0xff] }
0x1530   :  { %v2522_v23 = vpop.xlane.xlu1 %2521 }
0x1531   :  { %v2524_v24 = vsub.f32 %v2516_v17, %v2522_v23  ;;  %v2519_v45 = vpop.xlane.xlu0 %2518  ;;  %v3871_v23 = vpack.c.bf16 %v2893_v22, %v2892_v20 }
0x1532   :  { %v2523_v25 = vsub.f32 %v2515_v18, %v2519_v45  ;;  %v2895_v45 = vld [vmem:[%s4712_s1 + $0x298] sm:$0xff] }
0x1533   :  { %v2527_v26 = vmul.f32 1.442695, %v2524_v24  ;;  %3872 = vmatprep.subr.bf16.mxu0 %v3871_v23  ;;  %v2894_v24 = vld [vmem:[%s4712_s1 + $0x290] sm:$0xff] }
0x1534   :  { %v2525_v27 = vmul.f32 1.442695, %v2523_v25  ;;  %v3875_v25 = vpack.c.bf16 %v2895_v45, %v2894_v24 }
0x1535   :  { %3950 = vpow2.f32 %v2527_v26  ;;  %v2896_v26 = vld [vmem:[%s4712_s1 + $0x2a0] sm:$0xff] }
0x1536   :  { %3952 = vpow2.f32 %v2525_v27  ;;  %v2897_v27 = vld [vmem:[%s4712_s1 + $0x2a8] sm:$0xff] }
0x153f   :  { %v3951_v28 = vpop.eup %3950 }
0x1540   :  { %v3953_v30 = vpop.eup %3952  ;;  %v2532_v57 = vsel %vm542_vm8, %v3951_v28, 0.0 }
0x1541   :  { %2533 = vadd.xlane.f32.xlu1 %v2532_v57  ;;  %v2529_v60 = vsel %vm538_vm9, %v3953_v30, 0.0  ;;  %v2899_v57 = vld [vmem:[%s4712_s1 + $0x2b8] sm:$0xff] }
0x1542   :  { %2530 = vadd.xlane.f32.xlu0 %v2529_v60 }
0x15ce   :  { %v2534_v35 = vpop.xlane.xlu1 %2533 }
0x15cf   :  { %3954 = vrcp.f32 %v2534_v35  ;;  %v2531_v36 = vpop.xlane.xlu0 %2530 }
0x15d0   :  { %3956 = vrcp.f32 %v2531_v36 }
0x15d9   :  { %v3955_v37 = vpop.eup %3954 }
0x15da   :  { %v3957_v38 = vpop.eup %3956  ;;  %v2538_v39 = vmul.f32 %v3955_v37, %v3951_v28  ;;  %v3879_v28 = vpack.c.bf16 %v2897_v27, %v2896_v26  ;;  %v3256_v27 = vld [vmem:[%s4712_s1 + $0x1f5] ss:$0 sm:$0xff] }
0x15db   :  { %v2537_v62 = vmul.f32 %v3957_v38, %v3953_v30  ;;  %v2898_v30 = vld [vmem:[%s4712_s1 + $0x2b0] sm:$0xff] }
0x15dc   :  { %v3883_v60 = vpack.c.bf16 %v2899_v57, %v2898_v30 }
0x15dd   :  { %3620 = vmatprep.mubr.msk.f32.mxu1 %vm538_vm9, %v2537_v62 }
0x15de   :  { %3621 = vmatmul.mubr.msk.f32.vlgmr.msra.gmra.mrb[28].mxu1 %vm538_vm9, %v2538_v39 }
0x15df   :  { %3866 = vmatpush3.bf16.msra.mxu1 %v3863_v1 }
0x15e0   :  { %3868 = vmatprep.subr.bf16.mxu1 %v3867_v4 }
0x15e3   :  { %3870 = vmatpush3.bf16.msra.mxu1 %v3867_v4 }
0x16b1   :  { %v3622_v40 = vpop.f32.mrb[28].mxu1 }
0x16b2   :  { %v2614_v56 = vpop.f32.mrb[29].mxu1 }
0x16b3   :  { %3627 = vmatprep.mubr.msk.f32.mxu0 %vm446_vm3, %v2614_v56 }
0x16b4   :  { %3628 = vmatmul.mubr.msk.f32.vlgmr.msra.gmra.mrb[16].mxu0 %vm446_vm3, %v3622_v40 }
0x16b5   :  { %3874 = vmatpush3.bf16.msra.mxu0 %v3871_v23 }
0x16b6   :  { %3876 = vmatprep.subr.bf16.mxu0 %v3875_v25 }
0x16b9   :  { %3878 = vmatpush3.bf16.msra.mxu0 %v3875_v25 }
0x16ba   :  { %3880 = vmatprep.subr.bf16.mxu0 %v3879_v28 }
0x16bd   :  { %3882 = vmatpush3.bf16.msra.mxu0 %v3879_v28 }
0x16be   :  { %3884 = vmatprep.subr.bf16.mxu0 %v3883_v60 }
0x16c1   :  { %3886 = vmatpush3.bf16.msra.mxu0 %v3883_v60 }
0x1787   :  { %v3629_v42 = vpop.f32.mrb[16].mxu0 }
0x1788   :  { %v3895_v43 = vadd.f32 %v3629_v42, %v3224_v41  ;;  %v2697_v29 = vpop.f32.mrb[17].mxu0 }
0x1789   :  { %v3896_v44 = vadd.f32 %v3224_v41, %v2697_v29 }
0x178a   :  { %v4597_v46 = vadd.f32 %v3895_v43, %v4417_v21 }
0x178b   :  { %v4600_v34 = vadd.f32 %v3896_v44, %v4419_v19 }
0x178c   :  { %v2715_v47 = vsel %vm138_vm1, %v4597_v46, 0.0 }
0x178d   :  { %2716 = vadd.xlane.f32.xlu1 %v2715_v47  ;;  %v2712_v48 = vsel %vm134_vm0, %v4600_v34, 0.0 }
0x178e   :  { %2713 = vadd.xlane.f32.xlu0 %v2712_v48 }
0x181a   :  { %v2717_v49 = vpop.xlane.xlu1 %2716 }
0x181b   :  { %v2719_v50 = vmul.f32 0.03125, %v2717_v49  ;;  %v2714_v51 = vpop.xlane.xlu0 %2713 }
0x181c   :  { %v2718_v52 = vmul.f32 0.03125, %v2714_v51 }
0x181d   :  { %v2721_v53 = vsub.f32 %v4597_v46, %v2719_v50 }
0x181e   :  { %v2720_v21 = vsub.f32 %v4600_v34, %v2718_v52 }
0x181f   :  { %v2723_v54 = vmul.f32 %v2721_v53, %v2721_v53 }
0x1820   :  { %v2722_v55 = vmul.f32 %v2720_v21, %v2720_v21 }
0x1821   :  { %v2727_v19 = vsel %vm138_vm1, %v2723_v54, 0.0 }
0x1822   :  { %2728 = vadd.xlane.f32.xlu1 %v2727_v19  ;;  %v2724_v58 = vsel %vm134_vm0, %v2722_v55, 0.0 }
0x1823   :  { %2725 = vadd.xlane.f32.xlu0 %v2724_v58 }
0x18af   :  { %v2729_v5 = vpop.xlane.xlu1 %2728 }
0x18b0   :  { %v2731_v6 = vmul.f32 0.03125, %v2729_v5  ;;  %v2726_v7 = vpop.xlane.xlu0 %2725 }
0x18b1   :  { %v2730_v8 = vmul.f32 0.03125, %v2726_v7 }
0x18b2   :  { %v2733_v9 = vadd.f32 1e-06, %v2731_v6 }
0x18b3   :  { %v2732_v10 = vadd.f32 1e-06, %v2730_v8 }
0x18b4   :  { %3958 = vrsqrt.f32 %v2733_v9 }
0x18b5   :  { %3960 = vrsqrt.f32 %v2732_v10 }
0x18be   :  { %v3959_v11 = vpop.eup %3958 }
0x18bf   :  { %v3961_v14 = vpop.eup %3960  ;;  %v2737_v15 = vmul.f32 %v3959_v11, %v2721_v53 }
0x18c0   :  { %v2736_v13 = vmul.f32 %v3961_v14, %v2720_v21 }
0x18c1   :  { %v2743_v61 = vmul.f32 %v3249_v12, %v2737_v15 }
0x18c2   :  { %v2742_v16 = vmul.f32 %v3249_v12, %v2736_v13 }
0x18c3   :  { %v2749_v18 = vadd.f32 %v3250_v59, %v2743_v61 }
0x18c4   :  { %v2748_v17 = vadd.f32 %v3250_v59, %v2742_v16 }
0x18c6   :  { %3638 = vmatprep.mubr.msk.f32.mxu1 %vm134_vm0, %v2748_v17 }
0x18c7   :  { %3639 = vmatmul.mubr.msk.f32.vlgmr.msra.gmra.mrb[30].mxu1 %vm134_vm0, %v2749_v18 }
0x199a   :  { %v3640_v32 = vpop.f32.mrb[30].mxu1 }
0x199b   :  { %v2837_v33 = vadd.f32 %v3640_v32, %v3251_v31  ;;  %v2831_v35 = vpop.f32.mrb[31].mxu1 }
0x199c   :  { %v2832_v36 = vadd.f32 %v3251_v31, %v2831_v35 }
0x199d   :  { %v2843_v37 = vmul.f32 0.70710677, %v2837_v33  ;;  %v2841_v23 = vmul.f32 0.5, %v2837_v33 }
0x199e   :  { %v2842_v38 = vmul.f32 0.70710677, %v2832_v36  ;;  %v2840_v20 = vmul.f32 0.5, %v2832_v36 }
0x199f   :  { %v2845_v62 = vand.u32 2147483647, %v2843_v37  ;;  %v2871_v43 = vsub.f32 0.0, %v2843_v37  ;;  %vm2883_vm13 = vcmp.ge.f32.partialorder %v2843_v37, 0.0 }
0x19a0   :  { %v2844_v39 = vand.u32 2147483647, %v2842_v38  ;;  %v2870_v29 = vsub.f32 0.0, %v2842_v38  ;;  %vm2882_vm14 = vcmp.ge.f32.partialorder %v2842_v38, 0.0 }
0x19a1   :  { %v2847_v40 = vmul.f32 0.3275911, %v2845_v62  ;;  %v2873_v47 = vmul.f32 %v2871_v43, %v2843_v37  ;;  %v4001_v43 = vmov 0.0|0.0  }
0x19a2   :  { %v2846_v56 = vmul.f32 0.3275911, %v2844_v39  ;;  %v2872_v50 = vmul.f32 %v2870_v29, %v2842_v38  ;;  %3887 = vmatprep.subr.bf16.mxu1 %v4001_v43  ;;  %v3039_v29 = vld [vmem:[%s4712_s1 + $0x2d8] sm:$0xff] }
0x19a3   :  { %v2849_v41 = vadd.f32 1.0, %v2847_v40  ;;  %v2876_v53 = vmul.f32 1.442695, %v2873_v47 }
0x19a4   :  { %v2848_v42 = vadd.f32 1.0, %v2846_v56  ;;  %v2874_v55 = vmul.f32 1.442695, %v2872_v50  ;;  %v3037_v56 = vld [vmem:[%s4712_s1 + $0x2c8] sm:$0xff] }
0x19a5   :  { %3962 = vrcp.f32 %v2849_v41  ;;  %v3038_v41 = vld [vmem:[%s4712_s1 + $0x2d0] sm:$0xff] }
0x19a6   :  { %3964 = vrcp.f32 %v2848_v42  ;;  %v3888_v42 = vpack.c.bf16 %v3038_v41, %v3037_v56 }
0x19a7   :  { %3966 = vpow2.f32 %v2876_v53 }
0x19a8   :  { %3968 = vpow2.f32 %v2874_v55  ;;  %3889 = vmatpush3.bf16.msra.mxu1 %v3888_v42  ;;  %v3257_v55 = vld [vmem:[%s4712_s1 + $0x2c0] ss:$0 sm:$0xff] }
0x19a9   :  { %3890 = vmatprep.subr.bf16.mxu1 %v4001_v43 }
0x19af   :  { %v3963_v44 = vpop.eup %3962 }
0x19b0   :  { %v2853_v48 = vmul.f32 1.0614054, %v3963_v44  ;;  %v3965_v49 = vpop.eup %3964 }
0x19b1   :  { %v2852_v52 = vmul.f32 1.0614054, %v3965_v49  ;;  %v3967_v9 = vpop.eup %3966 }
0x19b2   :  { %v2855_v51 = vadd.f32 -1.4531521, %v2853_v48  ;;  %v3969_v12 = vpop.eup %3968  ;;  %v4003_v48 = vmov 0.0  }
0x19b3   :  { %v2854_v54 = vadd.f32 -1.4531521, %v2852_v52  ;;  %3668 = vmatprep.mubr.msk.f32.mxu1 %vm4002_vm15, %v4003_v48 }
0x19b4   :  { %v2857_v21 = vmul.f32 %v3963_v44, %v2855_v51 }
0x19b5   :  { %v2856_v58 = vmul.f32 %v3965_v49, %v2854_v54 }
0x19b6   :  { %v2859_v19 = vadd.f32 1.4214138, %v2857_v21 }
0x19b7   :  { %v2858_v0 = vadd.f32 1.4214138, %v2856_v58  ;;  %v3258_v58 = vld [vmem:[%s4712_s1 + $0x2c1] ss:$0 sm:$0xff] }
0x19b8   :  { %v2861_v63 = vmul.f32 %v3963_v44, %v2859_v19 }
0x19b9   :  { %v2860_v2 = vmul.f32 %v3965_v49, %v2858_v0 }
0x19ba   :  { %v2863_v1 = vadd.f32 -0.28449672, %v2861_v63 }
0x19bb   :  { %v2862_v4 = vadd.f32 -0.28449672, %v2860_v2 }
0x19bc   :  { %v2865_v3 = vmul.f32 %v3963_v44, %v2863_v1 }
0x19bd   :  { %v2864_v6 = vmul.f32 %v3965_v49, %v2862_v4 }
0x19be   :  { %v2867_v5 = vadd.f32 0.2548296, %v2865_v3 }
0x19bf   :  { %v2866_v8 = vadd.f32 0.2548296, %v2864_v6 }
0x19c0   :  { %v2869_v7 = vmul.f32 %v3963_v44, %v2867_v5  ;;  %v3040_v44 = vld [vmem:[%s4712_s1 + $0x2e0] sm:$0xff] }
0x19c1   :  { %v2868_v11 = vmul.f32 %v3965_v49, %v2866_v8  ;;  %v3891_v47 = vpack.c.bf16 %v3040_v44, %v3039_v29 }
0x19c2   :  { %v2879_v10 = vmul.f32 %v3967_v9, %v2869_v7  ;;  %v3259_v7 = vld [vmem:[%s4712_s1 + $0x2c2] ss:$0 sm:$0xff] }
0x19c3   :  { %v2878_v15 = vmul.f32 %v3969_v12, %v2868_v11  ;;  %3892 = vmatpush3.bf16.msra.mxu1 %v3891_v47 }
0x19c4   :  { %v2881_v14 = vsub.f32 1.0, %v2879_v10 }
0x19c5   :  { %v2880_v59 = vsub.f32 1.0, %v2878_v15 }
0x19c6   :  { %v2885_v13 = vsub.f32 0.0, %v2881_v14 }
0x19c7   :  { %v2884_v16 = vsub.f32 0.0, %v2880_v59 }
0x19c8   :  { %v2887_v61 = vsel %vm2883_vm13, %v2881_v14, %v2885_v13 }
0x19c9   :  { %v2889_v17 = vadd.f32 1.0, %v2887_v61  ;;  %v2886_v18 = vsel %vm2882_vm14, %v2880_v59, %v2884_v16 }
0x19ca   :  { %v2888_v22 = vadd.f32 1.0, %v2886_v18 }
0x19cb   :  { %v2891_v45 = vmul.f32 %v2889_v17, %v2841_v23 }
0x19cc   :  { %v2890_v24 = vmul.f32 %v2888_v22, %v2840_v20 }
0x19ce   :  { %3657 = vmatprep.mubr.msk.f32.mxu0 %vm1474_vm12, %v2890_v24 }
0x19cf   :  { %3658 = vmatmul.mubr.msk.f32.vlgmr.msra.gmra.mrb[22].mxu0 %vm1474_vm12, %v2891_v45 }
0x1aa2   :  { %v3659_v25 = vpop.f32.mrb[22].mxu0 }
0x1aa3   :  { %v2972_v26 = vpop.f32.mrb[23].mxu0  ;;  %v2982_v28 = vadd.f32 %v3659_v25, %v4597_v46 }
0x1aa4   :  { %v2981_v30 = vadd.f32 %v2972_v26, %v4600_v34 }
0x1aa5   :  { %v2989_v31 = vadd.f32 %v3256_v27, %v2982_v28 }
0x1aa6   :  { %v2988_v57 = vadd.f32 %v3256_v27, %v2981_v30 }
0x1aa7   :  { %v2995_v32 = vsel %vm138_vm1, %v2989_v31, 0.0 }
0x1aa8   :  { %v2992_v60 = vsel %vm134_vm0, %v2988_v57, 0.0 }
0x1aa9   :  { %2993 = vadd.xlane.f32.xlu0 %v2992_v60 }
0x1aad   :  { %2996 = vadd.xlane.f32.xlu0 %v2995_v32 }
0x1b36   :  { %v2994_v33 = vpop.xlane.xlu0 %2993 }
0x1b37   :  { %v2998_v35 = vmul.f32 0.03125, %v2994_v33 }
0x1b39   :  { %v3000_v36 = vsub.f32 %v2988_v57, %v2998_v35 }
0x1b3a   :  { %v2997_v37 = vpop.xlane.xlu0 %2996 }
0x1b3b   :  { %v2999_v38 = vmul.f32 0.03125, %v2997_v37  ;;  %v3002_v62 = vmul.f32 %v3000_v36, %v3000_v36 }
0x1b3d   :  { %v3001_v39 = vsub.f32 %v2989_v31, %v2999_v38  ;;  %v3004_v40 = vsel %vm134_vm0, %v3002_v62, 0.0 }
0x1b3e   :  { %3005 = vadd.xlane.f32.xlu1 %v3004_v40 }
0x1b3f   :  { %v3003_v46 = vmul.f32 %v3001_v39, %v3001_v39 }
0x1b41   :  { %v3007_v34 = vsel %vm138_vm1, %v3003_v46, 0.0 }
0x1b42   :  { %3008 = vadd.xlane.f32.xlu1 %v3007_v34 }
0x1bcb   :  { %v3006_v49 = vpop.xlane.xlu1 %3005 }
0x1bcc   :  { %v3010_v50 = vmul.f32 0.03125, %v3006_v49 }
0x1bce   :  { %v3012_v51 = vadd.f32 1e-06, %v3010_v50 }
0x1bcf   :  { %v3009_v52 = vpop.xlane.xlu1 %3008 }
0x1bd0   :  { %3970 = vrsqrt.f32 %v3012_v51  ;;  %v3011_v53 = vmul.f32 0.03125, %v3009_v52 }
0x1bd2   :  { %v3013_v21 = vadd.f32 1e-06, %v3011_v53 }
0x1bd4   :  { %3972 = vrsqrt.f32 %v3013_v21 }
0x1bda   :  { %v3971_v54 = vpop.eup %3970 }
0x1bdb   :  { %v3016_v19 = vmul.f32 %v3971_v54, %v3000_v36 }
0x1bdd   :  { %v3022_v63 = vmul.f32 %v3257_v55, %v3016_v19 }
0x1bde   :  { %v3973_v0 = vpop.eup %3972 }
0x1bdf   :  { %v3017_v1 = vmul.f32 %v3973_v0, %v3001_v39  ;;  %v3028_v2 = vadd.f32 %v3258_v58, %v3022_v63 }
0x1be1   :  { %v3023_v3 = vmul.f32 %v3257_v55, %v3017_v1  ;;  %3030 = vst.msk [vmem:[%s4714_s3] sm:$0xff] %vm134_vm0, %v3028_v2  ;;  %v3033_v4 = vrot.slane %v3028_v2, 4 }
0x1be3   :  { %v3029_v5 = vadd.f32 %v3258_v58, %v3023_v3  ;;  %v3036_v6 = vsel %vm3035_vm2, %v3028_v2, %v3033_v4 }
0x1be4   :  { %3669 = vmatmul.mubr.msk.f32.vlgmr.msra.gmra.mrb[32].mxu1 %vm134_vm0, %v3036_v6 }
0x1be5   :  { %3031 = vst.msk [vmem:[%s4714_s3 + $0x8] sm:$0x3] %vm138_vm1, %v3029_v5 }
0x1cb7   :  { %v3115_v8 = vpop.f32.mrb[32].mxu1 }
0x1cb8   :  { %v3116_v9 = vadd.f32 %v3259_v7, %v3115_v8  ;;  %v3670_v10 = vpop.f32.mrb[33].mxu1 }
0x1cba   :  { %3974 = vtanh.f32 %v3116_v9 }
0x1cc4   :  { %v3975_v11 = vpop.eup %3974 }
0x1cc5   :  { %3120 = vst.msk [vmem:[#allocation2] sm:$0x3] %vm138_vm1, %v3975_v11 }
0x1cc6   :  { %3987 = shalt.err (!%p3984_p4)
}
0x1cc7   :  { %s3988_s1 = scalar_lea.hbm %s4715_s4, 32 }
0x1cc8   :  { %p3989_p5 = scmp.ne.s32.totalorder %s4715_s4, %s3988_s1  ;;  %p3992_p6 = scmp.lt.u32.totalorder %s3988_s1, %s4715_s4 }
0x1cca   :  { %p3994_p7 = pnand %p3992_p6, %p3989_p5 }
0x1ccc   :  { %3997 = shalt.err (!%p3994_p7)
}
0x1ccd   :  { %3132 = dma.vmem_to_hbm [thread:$0]  %s3130_s10, 32, %s4715_s4, [#allocation3]  }
0x1cce   :  { %3998 = dma.done.wait [#allocation3], 32  }
0x1ccf   :  { %3999 = vsyncadd [#allocation3], 4294967264 }
0x1cd0   :  { %3138 = vsyncpa [#allocation3], 1 }

</bundles_post_ra>
